<compile_context>
chip_gen: v7x
topology: tpu7x:2x2x1
jax: 0.10.0
libtpu: 0.0.40
codegen_flags: <defaults>
</compile_context>

<pallas_src>
import numpy as np
import jax
import jax.numpy as jnp
from jax import lax
from jax.experimental import pallas as pl
from jax.experimental.pallas import tpu as pltpu

INPUT_DIM = 16
HIDDEN = 32
NUM_BLOCKS = 3
BATCH = 8
LN_EPS = 1e-5


def _layernorm(x, gamma, beta):
    mean = jnp.mean(x, axis=-1, keepdims=True)
    var = jnp.mean((x - mean) ** 2, axis=-1, keepdims=True)
    return (x - mean) * lax.rsqrt(var + LN_EPS) * gamma + beta


def finet_kernel(x_ref, emb_w_ref, emb_b_ref, emb_g_ref, emb_be_ref,
                 wqkv_ref, bqkv_ref, w1_ref, b1_ref, w2_ref, b2_ref,
                 lng_ref, lnb_ref, ow_ref, ob_ref, out_ref):
    x = x_ref[...]

    # embedding: Linear -> ReLU -> LayerNorm
    h = jnp.dot(x, emb_w_ref[...], preferred_element_type=jnp.float32) + emb_b_ref[...]
    h = jnp.maximum(h, 0.0)
    h = _layernorm(h, emb_g_ref[...], emb_be_ref[...])

    scale = 1.0 / jnp.sqrt(jnp.float32(HIDDEN))

    for i in range(NUM_BLOCKS):  # static unroll over blocks
        # Fused QKV: one (tile_b, H) @ (H, 3H) MXU pass instead of three,
        # single fused bias add instead of three separate broadcasts.
        qkv = jnp.dot(h, wqkv_ref[i], preferred_element_type=jnp.float32) + bqkv_ref[i]
        q = qkv[:, :HIDDEN]
        k = qkv[:, HIDDEN:2 * HIDDEN]
        v = qkv[:, 2 * HIDDEN:]

        # scores = q @ k^T with the transpose folded into the dot (no XLU vxpose)
        scores = lax.dot_general(
            q, k, dimension_numbers=(((1,), (1,)), ((), ())),
            preferred_element_type=jnp.float32) * scale
        scores = scores - jnp.max(scores, axis=-1, keepdims=True)
        e = jnp.exp(scores)
        attn = e * pl.reciprocal(jnp.sum(e, axis=-1, keepdims=True), approx=True)
        attn_out = jnp.dot(attn, v, preferred_element_type=jnp.float32)

        # dense1 + ReLU
        attn_out = jnp.dot(attn_out, w1_ref[i], preferred_element_type=jnp.float32) + b1_ref[i]
        attn_out = jnp.maximum(attn_out, 0.0)

        # feature interaction, dense2 + ReLU, residual, LayerNorm
        x_int = h * attn_out
        x_int = jnp.dot(x_int, w2_ref[i], preferred_element_type=jnp.float32) + b2_ref[i]
        x_int = jnp.maximum(x_int, 0.0)
        h = _layernorm(h + x_int, lng_ref[i], lnb_ref[i])
        # dropout: identity at inference time.

    # Output head (N=1): VPU multiply + lane reduce instead of an MXU pass.
    logits = jnp.sum(h * ow_ref[...], axis=-1, keepdims=True) + ob_ref[...]
    # sigmoid(x) = 1 / (1 + exp(-x)) with the reciprocal on the EUP (approx).
    out_ref[...] = pl.reciprocal(1.0 + jnp.exp(-logits), approx=True)


def finet_forward(x, params, tile_b=None):
    (emb_w, emb_b, emb_g, emb_be, wq, bq, wk, bk, wv, bv,
     w1, b1, w2, b2, lng, lnb, ow, ob) = params

    B = x.shape[0]
    # FeatureAttention mixes samples across the batch axis, so each batch tile
    # is an independent attention group; tile_b == B matches the full-batch
    # PyTorch forward exactly.  Larger serving batches tile with tile_b >= 512.
    if tile_b is None:
        tile_b = B
    num_tiles = pl.cdiv(B, tile_b)
    pad = num_tiles * tile_b - B
    if pad:
        x = jnp.pad(x, ((0, pad), (0, 0)))

    # Wrapper-side fusion: QKV weights/biases concatenated, head weight as row.
    wqkv = jnp.concatenate([wq, wk, wv], axis=-1)   # (NB, H, 3H)
    bqkv = jnp.concatenate([bq, bk, bv], axis=-1)   # (NB, 1, 3H)
    ow_row = ow.T                                   # (1, H)

    weights = (emb_w, emb_b, emb_g, emb_be, wqkv, bqkv,
               w1, b1, w2, b2, lng, lnb, ow_row, ob)

    def _resident(w):
        # Full-array block, same block every grid step -> weights stay VMEM
        # resident across the whole batch grid.
        return pl.BlockSpec(w.shape, lambda i, _nd=w.ndim: (0,) * _nd)

    in_specs = [pl.BlockSpec((tile_b, INPUT_DIM), lambda i: (i, 0))]
    in_specs += [_resident(w) for w in weights]
    out_specs = pl.BlockSpec((tile_b, 1), lambda i: (i, 0))
    # TODO(synk): for large batches emit a lane-dense (num_tiles, tile_b) output
    # slab and reshape in the wrapper instead of this last-dim-1 store.

    # Advisory cost estimate for the XLA scheduler.
    flops = (2 * B * INPUT_DIM * HIDDEN
             + NUM_BLOCKS * (2 * B * HIDDEN * 3 * HIDDEN      # fused QKV
                             + 4 * B * tile_b * HIDDEN        # scores + attn@V
                             + 4 * B * HIDDEN * HIDDEN)       # dense1 + dense2
             + 2 * B * HIDDEN)                                # head
    transcendentals = NUM_BLOCKS * B * tile_b + B + (NUM_BLOCKS + 1) * B
    bytes_accessed = (x.size + sum(int(w.size) for w in weights)
                      + num_tiles * tile_b) * 4

    out = pl.pallas_call(
        finet_kernel,
        out_shape=jax.ShapeDtypeStruct((num_tiles * tile_b, 1), jnp.float32),
        grid=(num_tiles,),
        in_specs=in_specs,
        out_specs=out_specs,
        compiler_params=pltpu.CompilerParams(
            dimension_semantics=("parallel",)),
        cost_estimate=pl.CostEstimate(
            flops=flops,
            transcendentals=transcendentals,
            bytes_accessed=bytes_accessed),
    )(x, *weights)
    return out[:B]


def finet_reference(x, params):
    """Plain-JAX reference mirroring the PyTorch forward, for verification."""
    (emb_w, emb_b, emb_g, emb_be, wq, bq, wk, bk, wv, bv,
     w1, b1, w2, b2, lng, lnb, ow, ob) = params
    h = jnp.maximum(x @ emb_w + emb_b, 0.0)
    h = _layernorm(h, emb_g, emb_be)
    for i in range(NUM_BLOCKS):
        q = h @ wq[i] + bq[i]
        k = h @ wk[i] + bk[i]
        v = h @ wv[i] + bv[i]
        attn = jax.nn.softmax((q @ k.T) / jnp.sqrt(jnp.float32(HIDDEN)), axis=-1)
        ao = jnp.maximum((attn @ v) @ w1[i] + b1[i], 0.0)
        xi = jnp.maximum((h * ao) @ w2[i] + b2[i], 0.0)
        h = _layernorm(h + xi, lng[i], lnb[i])
    return jax.nn.sigmoid(h @ ow + ob)


def init_params(key):
    ks = iter(jax.random.split(key, 32))

    def nrm(shape, scale=0.1):
        return (scale * jax.random.normal(next(ks), shape)).astype(jnp.float32)

    emb_w = nrm((INPUT_DIM, HIDDEN))
    emb_b = nrm((1, HIDDEN))
    emb_g = jnp.ones((1, HIDDEN), jnp.float32)
    emb_be = jnp.zeros((1, HIDDEN), jnp.float32)

    wq = nrm((NUM_BLOCKS, HIDDEN, HIDDEN)); bq = nrm((NUM_BLOCKS, 1, HIDDEN))
    wk = nrm((NUM_BLOCKS, HIDDEN, HIDDEN)); bk = nrm((NUM_BLOCKS, 1, HIDDEN))
    wv = nrm((NUM_BLOCKS, HIDDEN, HIDDEN)); bv = nrm((NUM_BLOCKS, 1, HIDDEN))
    w1 = nrm((NUM_BLOCKS, HIDDEN, HIDDEN)); b1 = nrm((NUM_BLOCKS, 1, HIDDEN))
    w2 = nrm((NUM_BLOCKS, HIDDEN, HIDDEN)); b2 = nrm((NUM_BLOCKS, 1, HIDDEN))
    lng = jnp.ones((NUM_BLOCKS, 1, HIDDEN), jnp.float32)
    lnb = jnp.zeros((NUM_BLOCKS, 1, HIDDEN), jnp.float32)

    ow = nrm((HIDDEN, 1))
    ob = nrm((1, 1))

    return (emb_w, emb_b, emb_g, emb_be, wq, bq, wk, bk, wv, bv,
            w1, b1, w2, b2, lng, lnb, ow, ob)


if __name__ == "__main__":
    key = jax.random.PRNGKey(0)
    k_x, k_p = jax.random.split(key)
    x = jax.random.normal(k_x, (BATCH, INPUT_DIM), dtype=jnp.float32)
    params = init_params(k_p)

    out = finet_forward(x, params)
    out = jax.block_until_ready(out)

    ref = finet_reference(x, params)

    assert out.shape == (BATCH, 1), out.shape
    assert bool(jnp.all(jnp.isfinite(out)))
    # approx EUP reciprocals introduce ~1e-4-level deviations; 3e-3 gives margin.
    np.testing.assert_allclose(np.asarray(out), np.asarray(ref), rtol=3e-3, atol=3e-3)

    print("KERNEL_OK")
</pallas_src>

<mosaic_0001>
module attributes {stable_mosaic.version = 11 : i64} {
  func.func @finet_kernel(%arg0: i32, %arg1: memref<8x16xf32, #tpu.memory_space<vmem>>, %arg2: memref<16x32xf32, #tpu.memory_space<vmem>>, %arg3: memref<1x32xf32, #tpu.memory_space<vmem>>, %arg4: memref<1x32xf32, #tpu.memory_space<vmem>>, %arg5: memref<1x32xf32, #tpu.memory_space<vmem>>, %arg6: memref<3x32x96xf32, #tpu.memory_space<vmem>>, %arg7: memref<3x1x96xf32, #tpu.memory_space<vmem>>, %arg8: memref<3x32x32xf32, #tpu.memory_space<vmem>>, %arg9: memref<3x1x32xf32, #tpu.memory_space<vmem>>, %arg10: memref<3x32x32xf32, #tpu.memory_space<vmem>>, %arg11: memref<3x1x32xf32, #tpu.memory_space<vmem>>, %arg12: memref<3x1x32xf32, #tpu.memory_space<vmem>>, %arg13: memref<3x1x32xf32, #tpu.memory_space<vmem>>, %arg14: memref<1x32xf32, #tpu.memory_space<vmem>>, %arg15: memref<1x1xf32, #tpu.memory_space<vmem>>, %arg16: memref<8x1xf32, #tpu.memory_space<vmem>>) attributes {dimension_semantics = [#tpu.dimension_semantics<parallel>], iteration_bounds = array<i64: 1>, scalar_prefetch = 0 : i64, scratch_operands = 0 : i64, tpu.core_type = #tpu.core_type<tc>, window_params = [{transform_indices = @transform_0, window_bounds = array<i64: 8, 16>}, {pipeline_mode = #tpu.pipeline_mode<synchronous>, transform_indices = @transform_1, window_bounds = array<i64: 16, 32>}, {pipeline_mode = #tpu.pipeline_mode<synchronous>, transform_indices = @transform_2, window_bounds = array<i64: 1, 32>}, {pipeline_mode = #tpu.pipeline_mode<synchronous>, transform_indices = @transform_3, window_bounds = array<i64: 1, 32>}, {pipeline_mode = #tpu.pipeline_mode<synchronous>, transform_indices = @transform_4, window_bounds = array<i64: 1, 32>}, {pipeline_mode = #tpu.pipeline_mode<synchronous>, transform_indices = @transform_5, window_bounds = array<i64: 3, 32, 96>}, {pipeline_mode = #tpu.pipeline_mode<synchronous>, transform_indices = @transform_6, window_bounds = array<i64: 3, 1, 96>}, {pipeline_mode = #tpu.pipeline_mode<synchronous>, transform_indices = @transform_7, window_bounds = array<i64: 3, 32, 32>}, {pipeline_mode = #tpu.pipeline_mode<synchronous>, transform_indices = @transform_8, window_bounds = array<i64: 3, 1, 32>}, {pipeline_mode = #tpu.pipeline_mode<synchronous>, transform_indices = @transform_9, window_bounds = array<i64: 3, 32, 32>}, {pipeline_mode = #tpu.pipeline_mode<synchronous>, transform_indices = @transform_10, window_bounds = array<i64: 3, 1, 32>}, {pipeline_mode = #tpu.pipeline_mode<synchronous>, transform_indices = @transform_11, window_bounds = array<i64: 3, 1, 32>}, {pipeline_mode = #tpu.pipeline_mode<synchronous>, transform_indices = @transform_12, window_bounds = array<i64: 3, 1, 32>}, {pipeline_mode = #tpu.pipeline_mode<synchronous>, transform_indices = @transform_13, window_bounds = array<i64: 1, 32>}, {pipeline_mode = #tpu.pipeline_mode<synchronous>, transform_indices = @transform_14, window_bounds = array<i64: 1, 1>}, {transform_indices = @transform_15, window_bounds = array<i64: 8, 1>}]} {
    %c0 = arith.constant 0 : index
    %c0_0 = arith.constant 0 : index
    %0 = vector.load %arg1[%c0, %c0_0] : memref<8x16xf32, #tpu.memory_space<vmem>>, vector<8x16xf32>
    %c0_1 = arith.constant 0 : index
    %c0_2 = arith.constant 0 : index
    %1 = vector.load %arg2[%c0_1, %c0_2] : memref<16x32xf32, #tpu.memory_space<vmem>>, vector<16x32xf32>
    %cst = arith.constant dense<0.000000e+00> : vector<8x32xf32>
    %2 = tpu.matmul %0, %1, %cst {dimension_numbers = #tpu.dot_dimension_numbers<[1], [0], [0], [1], [0, 0, 1, 1], [], []>} : vector<8x16xf32>, vector<16x32xf32>, vector<8x32xf32> -> vector<8x32xf32>
    %c0_3 = arith.constant 0 : index
    %c0_4 = arith.constant 0 : index
    %3 = vector.load %arg3[%c0_3, %c0_4] : memref<1x32xf32, #tpu.memory_space<vmem>>, vector<1x32xf32>
    %4 = vector.broadcast %3 : vector<1x32xf32> to vector<8x32xf32>
    %5 = arith.addf %2, %4 : vector<8x32xf32>
    %cst_5 = arith.constant 0.000000e+00 : f32
    %6 = vector.broadcast %cst_5 : f32 to vector<8x32xf32>
    %7 = arith.maximumf %5, %6 : vector<8x32xf32>
    %c0_6 = arith.constant 0 : index
    %c0_7 = arith.constant 0 : index
    %8 = vector.load %arg4[%c0_6, %c0_7] : memref<1x32xf32, #tpu.memory_space<vmem>>, vector<1x32xf32>
    %c0_8 = arith.constant 0 : index
    %c0_9 = arith.constant 0 : index
    %9 = vector.load %arg5[%c0_8, %c0_9] : memref<1x32xf32, #tpu.memory_space<vmem>>, vector<1x32xf32>
    %cst_10 = arith.constant dense<0.000000e+00> : vector<8xf32>
    %10 = vector.multi_reduction <add>, %7, %cst_10 [1] : vector<8x32xf32> to vector<8xf32>
    %11 = vector.shape_cast %10 : vector<8xf32> to vector<8x1xf32>
    %cst_11 = arith.constant 3.200000e+01 : f32
    %12 = vector.broadcast %cst_11 : f32 to vector<8x1xf32>
    %13 = arith.divf %11, %12 : vector<8x1xf32>
    %14 = vector.broadcast %13 : vector<8x1xf32> to vector<8x32xf32>
    %15 = arith.subf %7, %14 : vector<8x32xf32>
    %16 = arith.mulf %15, %15 : vector<8x32xf32>
    %cst_12 = arith.constant dense<0.000000e+00> : vector<8xf32>
    %17 = vector.multi_reduction <add>, %16, %cst_12 [1] : vector<8x32xf32> to vector<8xf32>
    %18 = vector.shape_cast %17 : vector<8xf32> to vector<8x1xf32>
    %cst_13 = arith.constant 3.200000e+01 : f32
    %19 = vector.broadcast %cst_13 : f32 to vector<8x1xf32>
    %20 = arith.divf %18, %19 : vector<8x1xf32>
    %21 = vector.broadcast %13 : vector<8x1xf32> to vector<8x32xf32>
    %22 = arith.subf %7, %21 : vector<8x32xf32>
    %cst_14 = arith.constant 9.99999974E-6 : f32
    %23 = vector.broadcast %cst_14 : f32 to vector<8x1xf32>
    %24 = arith.addf %20, %23 : vector<8x1xf32>
    %25 = math.rsqrt %24 : vector<8x1xf32>
    %26 = vector.broadcast %25 : vector<8x1xf32> to vector<8x32xf32>
    %27 = arith.mulf %22, %26 : vector<8x32xf32>
    %28 = vector.broadcast %8 : vector<1x32xf32> to vector<8x32xf32>
    %29 = arith.mulf %27, %28 : vector<8x32xf32>
    %30 = vector.broadcast %9 : vector<1x32xf32> to vector<8x32xf32>
    %31 = arith.addf %29, %30 : vector<8x32xf32>
    %cst_15 = arith.constant 3.200000e+01 : f32
    %32 = math.sqrt %cst_15 : f32
    %cst_16 = arith.constant 1.000000e+00 : f32
    %33 = arith.divf %cst_16, %32 : f32
    %c0_17 = arith.constant 0 : index
    %c0_18 = arith.constant 0 : index
    %c0_19 = arith.constant 0 : index
    %34 = vector.load %arg6[%c0_17, %c0_18, %c0_19] : memref<3x32x96xf32, #tpu.memory_space<vmem>>, vector<1x32x96xf32>
    %35 = vector.shape_cast %34 : vector<1x32x96xf32> to vector<32x96xf32>
    %cst_20 = arith.constant dense<0.000000e+00> : vector<8x96xf32>
    %36 = tpu.matmul %31, %35, %cst_20 {dimension_numbers = #tpu.dot_dimension_numbers<[1], [0], [0], [1], [0, 0, 1, 1], [], []>} : vector<8x32xf32>, vector<32x96xf32>, vector<8x96xf32> -> vector<8x96xf32>
    %c0_21 = arith.constant 0 : index
    %c0_22 = arith.constant 0 : index
    %c0_23 = arith.constant 0 : index
    %37 = vector.load %arg7[%c0_21, %c0_22, %c0_23] : memref<3x1x96xf32, #tpu.memory_space<vmem>>, vector<1x1x96xf32>
    %38 = vector.shape_cast %37 : vector<1x1x96xf32> to vector<1x96xf32>
    %39 = vector.broadcast %38 : vector<1x96xf32> to vector<8x96xf32>
    %40 = arith.addf %36, %39 : vector<8x96xf32>
    %41 = vector.extract_strided_slice %40 {offsets = [0, 0], sizes = [8, 32], strides = [1, 1]} : vector<8x96xf32> to vector<8x32xf32>
    %42 = vector.extract_strided_slice %40 {offsets = [0, 32], sizes = [8, 32], strides = [1, 1]} : vector<8x96xf32> to vector<8x32xf32>
    %43 = vector.extract_strided_slice %40 {offsets = [0, 64], sizes = [8, 32], strides = [1, 1]} : vector<8x96xf32> to vector<8x32xf32>
    %cst_24 = arith.constant dense<0.000000e+00> : vector<8x8xf32>
    %44 = tpu.matmul %41, %42, %cst_24 {dimension_numbers = #tpu.dot_dimension_numbers<[1], [1], [0], [0], [0, 0, 1, 0], [], []>} : vector<8x32xf32>, vector<8x32xf32>, vector<8x8xf32> -> vector<8x8xf32>
    %45 = vector.broadcast %33 : f32 to vector<8x8xf32>
    %46 = arith.mulf %44, %45 : vector<8x8xf32>
    %cst_25 = arith.constant dense<0xFF800000> : vector<8xf32>
    %47 = vector.multi_reduction <maximumf>, %46, %cst_25 [1] : vector<8x8xf32> to vector<8xf32>
    %48 = vector.shape_cast %47 : vector<8xf32> to vector<8x1xf32>
    %49 = vector.broadcast %48 : vector<8x1xf32> to vector<8x8xf32>
    %50 = arith.subf %46, %49 : vector<8x8xf32>
    %51 = math.exp %50 : vector<8x8xf32>
    %cst_26 = arith.constant dense<0.000000e+00> : vector<8xf32>
    %52 = vector.multi_reduction <add>, %51, %cst_26 [1] : vector<8x8xf32> to vector<8xf32>
    %53 = vector.shape_cast %52 : vector<8xf32> to vector<8x1xf32>
    %54 = tpu.reciprocal %53 {approx = true} : vector<8x1xf32> -> vector<8x1xf32>
    %55 = vector.broadcast %54 : vector<8x1xf32> to vector<8x8xf32>
    %56 = arith.mulf %51, %55 : vector<8x8xf32>
    %cst_27 = arith.constant dense<0.000000e+00> : vector<8x32xf32>
    %57 = tpu.matmul %56, %43, %cst_27 {dimension_numbers = #tpu.dot_dimension_numbers<[1], [0], [0], [1], [0, 0, 1, 1], [], []>} : vector<8x8xf32>, vector<8x32xf32>, vector<8x32xf32> -> vector<8x32xf32>
    %c0_28 = arith.constant 0 : index
    %c0_29 = arith.constant 0 : index
    %c0_30 = arith.constant 0 : index
    %58 = vector.load %arg8[%c0_28, %c0_29, %c0_30] : memref<3x32x32xf32, #tpu.memory_space<vmem>>, vector<1x32x32xf32>
    %59 = vector.shape_cast %58 : vector<1x32x32xf32> to vector<32x32xf32>
    %cst_31 = arith.constant dense<0.000000e+00> : vector<8x32xf32>
    %60 = tpu.matmul %57, %59, %cst_31 {dimension_numbers = #tpu.dot_dimension_numbers<[1], [0], [0], [1], [0, 0, 1, 1], [], []>} : vector<8x32xf32>, vector<32x32xf32>, vector<8x32xf32> -> vector<8x32xf32>
    %c0_32 = arith.constant 0 : index
    %c0_33 = arith.constant 0 : index
    %c0_34 = arith.constant 0 : index
    %61 = vector.load %arg9[%c0_32, %c0_33, %c0_34] : memref<3x1x32xf32, #tpu.memory_space<vmem>>, vector<1x1x32xf32>
    %62 = vector.shape_cast %61 : vector<1x1x32xf32> to vector<1x32xf32>
    %63 = vector.broadcast %62 : vector<1x32xf32> to vector<8x32xf32>
    %64 = arith.addf %60, %63 : vector<8x32xf32>
    %cst_35 = arith.constant 0.000000e+00 : f32
    %65 = vector.broadcast %cst_35 : f32 to vector<8x32xf32>
    %66 = arith.maximumf %64, %65 : vector<8x32xf32>
    %67 = arith.mulf %31, %66 : vector<8x32xf32>
    %c0_36 = arith.constant 0 : index
    %c0_37 = arith.constant 0 : index
    %c0_38 = arith.constant 0 : index
    %68 = vector.load %arg10[%c0_36, %c0_37, %c0_38] : memref<3x32x32xf32, #tpu.memory_space<vmem>>, vector<1x32x32xf32>
    %69 = vector.shape_cast %68 : vector<1x32x32xf32> to vector<32x32xf32>
    %cst_39 = arith.constant dense<0.000000e+00> : vector<8x32xf32>
    %70 = tpu.matmul %67, %69, %cst_39 {dimension_numbers = #tpu.dot_dimension_numbers<[1], [0], [0], [1], [0, 0, 1, 1], [], []>} : vector<8x32xf32>, vector<32x32xf32>, vector<8x32xf32> -> vector<8x32xf32>
    %c0_40 = arith.constant 0 : index
    %c0_41 = arith.constant 0 : index
    %c0_42 = arith.constant 0 : index
    %71 = vector.load %arg11[%c0_40, %c0_41, %c0_42] : memref<3x1x32xf32, #tpu.memory_space<vmem>>, vector<1x1x32xf32>
    %72 = vector.shape_cast %71 : vector<1x1x32xf32> to vector<1x32xf32>
    %73 = vector.broadcast %72 : vector<1x32xf32> to vector<8x32xf32>
    %74 = arith.addf %70, %73 : vector<8x32xf32>
    %cst_43 = arith.constant 0.000000e+00 : f32
    %75 = vector.broadcast %cst_43 : f32 to vector<8x32xf32>
    %76 = arith.maximumf %74, %75 : vector<8x32xf32>
    %77 = arith.addf %31, %76 : vector<8x32xf32>
    %c0_44 = arith.constant 0 : index
    %c0_45 = arith.constant 0 : index
    %c0_46 = arith.constant 0 : index
    %78 = vector.load %arg12[%c0_44, %c0_45, %c0_46] : memref<3x1x32xf32, #tpu.memory_space<vmem>>, vector<1x1x32xf32>
    %79 = vector.shape_cast %78 : vector<1x1x32xf32> to vector<1x32xf32>
    %c0_47 = arith.constant 0 : index
    %c0_48 = arith.constant 0 : index
    %c0_49 = arith.constant 0 : index
    %80 = vector.load %arg13[%c0_47, %c0_48, %c0_49] : memref<3x1x32xf32, #tpu.memory_space<vmem>>, vector<1x1x32xf32>
    %81 = vector.shape_cast %80 : vector<1x1x32xf32> to vector<1x32xf32>
    %cst_50 = arith.constant dense<0.000000e+00> : vector<8xf32>
    %82 = vector.multi_reduction <add>, %77, %cst_50 [1] : vector<8x32xf32> to vector<8xf32>
    %83 = vector.shape_cast %82 : vector<8xf32> to vector<8x1xf32>
    %cst_51 = arith.constant 3.200000e+01 : f32
    %84 = vector.broadcast %cst_51 : f32 to vector<8x1xf32>
    %85 = arith.divf %83, %84 : vector<8x1xf32>
    %86 = vector.broadcast %85 : vector<8x1xf32> to vector<8x32xf32>
    %87 = arith.subf %77, %86 : vector<8x32xf32>
    %88 = arith.mulf %87, %87 : vector<8x32xf32>
    %cst_52 = arith.constant dense<0.000000e+00> : vector<8xf32>
    %89 = vector.multi_reduction <add>, %88, %cst_52 [1] : vector<8x32xf32> to vector<8xf32>
    %90 = vector.shape_cast %89 : vector<8xf32> to vector<8x1xf32>
    %cst_53 = arith.constant 3.200000e+01 : f32
    %91 = vector.broadcast %cst_53 : f32 to vector<8x1xf32>
    %92 = arith.divf %90, %91 : vector<8x1xf32>
    %93 = vector.broadcast %85 : vector<8x1xf32> to vector<8x32xf32>
    %94 = arith.subf %77, %93 : vector<8x32xf32>
    %cst_54 = arith.constant 9.99999974E-6 : f32
    %95 = vector.broadcast %cst_54 : f32 to vector<8x1xf32>
    %96 = arith.addf %92, %95 : vector<8x1xf32>
    %97 = math.rsqrt %96 : vector<8x1xf32>
    %98 = vector.broadcast %97 : vector<8x1xf32> to vector<8x32xf32>
    %99 = arith.mulf %94, %98 : vector<8x32xf32>
    %100 = vector.broadcast %79 : vector<1x32xf32> to vector<8x32xf32>
    %101 = arith.mulf %99, %100 : vector<8x32xf32>
    %102 = vector.broadcast %81 : vector<1x32xf32> to vector<8x32xf32>
    %103 = arith.addf %101, %102 : vector<8x32xf32>
    %c1 = arith.constant 1 : index
    %c0_55 = arith.constant 0 : index
    %c0_56 = arith.constant 0 : index
    %104 = vector.load %arg6[%c1, %c0_55, %c0_56] : memref<3x32x96xf32, #tpu.memory_space<vmem>>, vector<1x32x96xf32>
    %105 = vector.shape_cast %104 : vector<1x32x96xf32> to vector<32x96xf32>
    %cst_57 = arith.constant dense<0.000000e+00> : vector<8x96xf32>
    %106 = tpu.matmul %103, %105, %cst_57 {dimension_numbers = #tpu.dot_dimension_numbers<[1], [0], [0], [1], [0, 0, 1, 1], [], []>} : vector<8x32xf32>, vector<32x96xf32>, vector<8x96xf32> -> vector<8x96xf32>
    %c1_58 = arith.constant 1 : index
    %c0_59 = arith.constant 0 : index
    %c0_60 = arith.constant 0 : index
    %107 = vector.load %arg7[%c1_58, %c0_59, %c0_60] : memref<3x1x96xf32, #tpu.memory_space<vmem>>, vector<1x1x96xf32>
    %108 = vector.shape_cast %107 : vector<1x1x96xf32> to vector<1x96xf32>
    %109 = vector.broadcast %108 : vector<1x96xf32> to vector<8x96xf32>
    %110 = arith.addf %106, %109 : vector<8x96xf32>
    %111 = vector.extract_strided_slice %110 {offsets = [0, 0], sizes = [8, 32], strides = [1, 1]} : vector<8x96xf32> to vector<8x32xf32>
    %112 = vector.extract_strided_slice %110 {offsets = [0, 32], sizes = [8, 32], strides = [1, 1]} : vector<8x96xf32> to vector<8x32xf32>
    %113 = vector.extract_strided_slice %110 {offsets = [0, 64], sizes = [8, 32], strides = [1, 1]} : vector<8x96xf32> to vector<8x32xf32>
    %cst_61 = arith.constant dense<0.000000e+00> : vector<8x8xf32>
    %114 = tpu.matmul %111, %112, %cst_61 {dimension_numbers = #tpu.dot_dimension_numbers<[1], [1], [0], [0], [0, 0, 1, 0], [], []>} : vector<8x32xf32>, vector<8x32xf32>, vector<8x8xf32> -> vector<8x8xf32>
    %115 = vector.broadcast %33 : f32 to vector<8x8xf32>
    %116 = arith.mulf %114, %115 : vector<8x8xf32>
    %cst_62 = arith.constant dense<0xFF800000> : vector<8xf32>
    %117 = vector.multi_reduction <maximumf>, %116, %cst_62 [1] : vector<8x8xf32> to vector<8xf32>
    %118 = vector.shape_cast %117 : vector<8xf32> to vector<8x1xf32>
    %119 = vector.broadcast %118 : vector<8x1xf32> to vector<8x8xf32>
    %120 = arith.subf %116, %119 : vector<8x8xf32>
    %121 = math.exp %120 : vector<8x8xf32>
    %cst_63 = arith.constant dense<0.000000e+00> : vector<8xf32>
    %122 = vector.multi_reduction <add>, %121, %cst_63 [1] : vector<8x8xf32> to vector<8xf32>
    %123 = vector.shape_cast %122 : vector<8xf32> to vector<8x1xf32>
    %124 = tpu.reciprocal %123 {approx = true} : vector<8x1xf32> -> vector<8x1xf32>
    %125 = vector.broadcast %124 : vector<8x1xf32> to vector<8x8xf32>
    %126 = arith.mulf %121, %125 : vector<8x8xf32>
    %cst_64 = arith.constant dense<0.000000e+00> : vector<8x32xf32>
    %127 = tpu.matmul %126, %113, %cst_64 {dimension_numbers = #tpu.dot_dimension_numbers<[1], [0], [0], [1], [0, 0, 1, 1], [], []>} : vector<8x8xf32>, vector<8x32xf32>, vector<8x32xf32> -> vector<8x32xf32>
    %c1_65 = arith.constant 1 : index
    %c0_66 = arith.constant 0 : index
    %c0_67 = arith.constant 0 : index
    %128 = vector.load %arg8[%c1_65, %c0_66, %c0_67] : memref<3x32x32xf32, #tpu.memory_space<vmem>>, vector<1x32x32xf32>
    %129 = vector.shape_cast %128 : vector<1x32x32xf32> to vector<32x32xf32>
    %cst_68 = arith.constant dense<0.000000e+00> : vector<8x32xf32>
    %130 = tpu.matmul %127, %129, %cst_68 {dimension_numbers = #tpu.dot_dimension_numbers<[1], [0], [0], [1], [0, 0, 1, 1], [], []>} : vector<8x32xf32>, vector<32x32xf32>, vector<8x32xf32> -> vector<8x32xf32>
    %c1_69 = arith.constant 1 : index
    %c0_70 = arith.constant 0 : index
    %c0_71 = arith.constant 0 : index
    %131 = vector.load %arg9[%c1_69, %c0_70, %c0_71] : memref<3x1x32xf32, #tpu.memory_space<vmem>>, vector<1x1x32xf32>
    %132 = vector.shape_cast %131 : vector<1x1x32xf32> to vector<1x32xf32>
    %133 = vector.broadcast %132 : vector<1x32xf32> to vector<8x32xf32>
    %134 = arith.addf %130, %133 : vector<8x32xf32>
    %cst_72 = arith.constant 0.000000e+00 : f32
    %135 = vector.broadcast %cst_72 : f32 to vector<8x32xf32>
    %136 = arith.maximumf %134, %135 : vector<8x32xf32>
    %137 = arith.mulf %103, %136 : vector<8x32xf32>
    %c1_73 = arith.constant 1 : index
    %c0_74 = arith.constant 0 : index
    %c0_75 = arith.constant 0 : index
    %138 = vector.load %arg10[%c1_73, %c0_74, %c0_75] : memref<3x32x32xf32, #tpu.memory_space<vmem>>, vector<1x32x32xf32>
    %139 = vector.shape_cast %138 : vector<1x32x32xf32> to vector<32x32xf32>
    %cst_76 = arith.constant dense<0.000000e+00> : vector<8x32xf32>
    %140 = tpu.matmul %137, %139, %cst_76 {dimension_numbers = #tpu.dot_dimension_numbers<[1], [0], [0], [1], [0, 0, 1, 1], [], []>} : vector<8x32xf32>, vector<32x32xf32>, vector<8x32xf32> -> vector<8x32xf32>
    %c1_77 = arith.constant 1 : index
    %c0_78 = arith.constant 0 : index
    %c0_79 = arith.constant 0 : index
    %141 = vector.load %arg11[%c1_77, %c0_78, %c0_79] : memref<3x1x32xf32, #tpu.memory_space<vmem>>, vector<1x1x32xf32>
    %142 = vector.shape_cast %141 : vector<1x1x32xf32> to vector<1x32xf32>
    %143 = vector.broadcast %142 : vector<1x32xf32> to vector<8x32xf32>
    %144 = arith.addf %140, %143 : vector<8x32xf32>
    %cst_80 = arith.constant 0.000000e+00 : f32
    %145 = vector.broadcast %cst_80 : f32 to vector<8x32xf32>
    %146 = arith.maximumf %144, %145 : vector<8x32xf32>
    %147 = arith.addf %103, %146 : vector<8x32xf32>
    %c1_81 = arith.constant 1 : index
    %c0_82 = arith.constant 0 : index
    %c0_83 = arith.constant 0 : index
    %148 = vector.load %arg12[%c1_81, %c0_82, %c0_83] : memref<3x1x32xf32, #tpu.memory_space<vmem>>, vector<1x1x32xf32>
    %149 = vector.shape_cast %148 : vector<1x1x32xf32> to vector<1x32xf32>
    %c1_84 = arith.constant 1 : index
    %c0_85 = arith.constant 0 : index
    %c0_86 = arith.constant 0 : index
    %150 = vector.load %arg13[%c1_84, %c0_85, %c0_86] : memref<3x1x32xf32, #tpu.memory_space<vmem>>, vector<1x1x32xf32>
    %151 = vector.shape_cast %150 : vector<1x1x32xf32> to vector<1x32xf32>
    %cst_87 = arith.constant dense<0.000000e+00> : vector<8xf32>
    %152 = vector.multi_reduction <add>, %147, %cst_87 [1] : vector<8x32xf32> to vector<8xf32>
    %153 = vector.shape_cast %152 : vector<8xf32> to vector<8x1xf32>
    %cst_88 = arith.constant 3.200000e+01 : f32
    %154 = vector.broadcast %cst_88 : f32 to vector<8x1xf32>
    %155 = arith.divf %153, %154 : vector<8x1xf32>
    %156 = vector.broadcast %155 : vector<8x1xf32> to vector<8x32xf32>
    %157 = arith.subf %147, %156 : vector<8x32xf32>
    %158 = arith.mulf %157, %157 : vector<8x32xf32>
    %cst_89 = arith.constant dense<0.000000e+00> : vector<8xf32>
    %159 = vector.multi_reduction <add>, %158, %cst_89 [1] : vector<8x32xf32> to vector<8xf32>
    %160 = vector.shape_cast %159 : vector<8xf32> to vector<8x1xf32>
    %cst_90 = arith.constant 3.200000e+01 : f32
    %161 = vector.broadcast %cst_90 : f32 to vector<8x1xf32>
    %162 = arith.divf %160, %161 : vector<8x1xf32>
    %163 = vector.broadcast %155 : vector<8x1xf32> to vector<8x32xf32>
    %164 = arith.subf %147, %163 : vector<8x32xf32>
    %cst_91 = arith.constant 9.99999974E-6 : f32
    %165 = vector.broadcast %cst_91 : f32 to vector<8x1xf32>
    %166 = arith.addf %162, %165 : vector<8x1xf32>
    %167 = math.rsqrt %166 : vector<8x1xf32>
    %168 = vector.broadcast %167 : vector<8x1xf32> to vector<8x32xf32>
    %169 = arith.mulf %164, %168 : vector<8x32xf32>
    %170 = vector.broadcast %149 : vector<1x32xf32> to vector<8x32xf32>
    %171 = arith.mulf %169, %170 : vector<8x32xf32>
    %172 = vector.broadcast %151 : vector<1x32xf32> to vector<8x32xf32>
    %173 = arith.addf %171, %172 : vector<8x32xf32>
    %c2 = arith.constant 2 : index
    %c0_92 = arith.constant 0 : index
    %c0_93 = arith.constant 0 : index
    %174 = vector.load %arg6[%c2, %c0_92, %c0_93] : memref<3x32x96xf32, #tpu.memory_space<vmem>>, vector<1x32x96xf32>
    %175 = vector.shape_cast %174 : vector<1x32x96xf32> to vector<32x96xf32>
    %cst_94 = arith.constant dense<0.000000e+00> : vector<8x96xf32>
    %176 = tpu.matmul %173, %175, %cst_94 {dimension_numbers = #tpu.dot_dimension_numbers<[1], [0], [0], [1], [0, 0, 1, 1], [], []>} : vector<8x32xf32>, vector<32x96xf32>, vector<8x96xf32> -> vector<8x96xf32>
    %c2_95 = arith.constant 2 : index
    %c0_96 = arith.constant 0 : index
    %c0_97 = arith.constant 0 : index
    %177 = vector.load %arg7[%c2_95, %c0_96, %c0_97] : memref<3x1x96xf32, #tpu.memory_space<vmem>>, vector<1x1x96xf32>
    %178 = vector.shape_cast %177 : vector<1x1x96xf32> to vector<1x96xf32>
    %179 = vector.broadcast %178 : vector<1x96xf32> to vector<8x96xf32>
    %180 = arith.addf %176, %179 : vector<8x96xf32>
    %181 = vector.extract_strided_slice %180 {offsets = [0, 0], sizes = [8, 32], strides = [1, 1]} : vector<8x96xf32> to vector<8x32xf32>
    %182 = vector.extract_strided_slice %180 {offsets = [0, 32], sizes = [8, 32], strides = [1, 1]} : vector<8x96xf32> to vector<8x32xf32>
    %183 = vector.extract_strided_slice %180 {offsets = [0, 64], sizes = [8, 32], strides = [1, 1]} : vector<8x96xf32> to vector<8x32xf32>
    %cst_98 = arith.constant dense<0.000000e+00> : vector<8x8xf32>
    %184 = tpu.matmul %181, %182, %cst_98 {dimension_numbers = #tpu.dot_dimension_numbers<[1], [1], [0], [0], [0, 0, 1, 0], [], []>} : vector<8x32xf32>, vector<8x32xf32>, vector<8x8xf32> -> vector<8x8xf32>
    %185 = vector.broadcast %33 : f32 to vector<8x8xf32>
    %186 = arith.mulf %184, %185 : vector<8x8xf32>
    %cst_99 = arith.constant dense<0xFF800000> : vector<8xf32>
    %187 = vector.multi_reduction <maximumf>, %186, %cst_99 [1] : vector<8x8xf32> to vector<8xf32>
    %188 = vector.shape_cast %187 : vector<8xf32> to vector<8x1xf32>
    %189 = vector.broadcast %188 : vector<8x1xf32> to vector<8x8xf32>
    %190 = arith.subf %186, %189 : vector<8x8xf32>
    %191 = math.exp %190 : vector<8x8xf32>
    %cst_100 = arith.constant dense<0.000000e+00> : vector<8xf32>
    %192 = vector.multi_reduction <add>, %191, %cst_100 [1] : vector<8x8xf32> to vector<8xf32>
    %193 = vector.shape_cast %192 : vector<8xf32> to vector<8x1xf32>
    %194 = tpu.reciprocal %193 {approx = true} : vector<8x1xf32> -> vector<8x1xf32>
    %195 = vector.broadcast %194 : vector<8x1xf32> to vector<8x8xf32>
    %196 = arith.mulf %191, %195 : vector<8x8xf32>
    %cst_101 = arith.constant dense<0.000000e+00> : vector<8x32xf32>
    %197 = tpu.matmul %196, %183, %cst_101 {dimension_numbers = #tpu.dot_dimension_numbers<[1], [0], [0], [1], [0, 0, 1, 1], [], []>} : vector<8x8xf32>, vector<8x32xf32>, vector<8x32xf32> -> vector<8x32xf32>
    %c2_102 = arith.constant 2 : index
    %c0_103 = arith.constant 0 : index
    %c0_104 = arith.constant 0 : index
    %198 = vector.load %arg8[%c2_102, %c0_103, %c0_104] : memref<3x32x32xf32, #tpu.memory_space<vmem>>, vector<1x32x32xf32>
    %199 = vector.shape_cast %198 : vector<1x32x32xf32> to vector<32x32xf32>
    %cst_105 = arith.constant dense<0.000000e+00> : vector<8x32xf32>
    %200 = tpu.matmul %197, %199, %cst_105 {dimension_numbers = #tpu.dot_dimension_numbers<[1], [0], [0], [1], [0, 0, 1, 1], [], []>} : vector<8x32xf32>, vector<32x32xf32>, vector<8x32xf32> -> vector<8x32xf32>
    %c2_106 = arith.constant 2 : index
    %c0_107 = arith.constant 0 : index
    %c0_108 = arith.constant 0 : index
    %201 = vector.load %arg9[%c2_106, %c0_107, %c0_108] : memref<3x1x32xf32, #tpu.memory_space<vmem>>, vector<1x1x32xf32>
    %202 = vector.shape_cast %201 : vector<1x1x32xf32> to vector<1x32xf32>
    %203 = vector.broadcast %202 : vector<1x32xf32> to vector<8x32xf32>
    %204 = arith.addf %200, %203 : vector<8x32xf32>
    %cst_109 = arith.constant 0.000000e+00 : f32
    %205 = vector.broadcast %cst_109 : f32 to vector<8x32xf32>
    %206 = arith.maximumf %204, %205 : vector<8x32xf32>
    %207 = arith.mulf %173, %206 : vector<8x32xf32>
    %c2_110 = arith.constant 2 : index
    %c0_111 = arith.constant 0 : index
    %c0_112 = arith.constant 0 : index
    %208 = vector.load %arg10[%c2_110, %c0_111, %c0_112] : memref<3x32x32xf32, #tpu.memory_space<vmem>>, vector<1x32x32xf32>
    %209 = vector.shape_cast %208 : vector<1x32x32xf32> to vector<32x32xf32>
    %cst_113 = arith.constant dense<0.000000e+00> : vector<8x32xf32>
    %210 = tpu.matmul %207, %209, %cst_113 {dimension_numbers = #tpu.dot_dimension_numbers<[1], [0], [0], [1], [0, 0, 1, 1], [], []>} : vector<8x32xf32>, vector<32x32xf32>, vector<8x32xf32> -> vector<8x32xf32>
    %c2_114 = arith.constant 2 : index
    %c0_115 = arith.constant 0 : index
    %c0_116 = arith.constant 0 : index
    %211 = vector.load %arg11[%c2_114, %c0_115, %c0_116] : memref<3x1x32xf32, #tpu.memory_space<vmem>>, vector<1x1x32xf32>
    %212 = vector.shape_cast %211 : vector<1x1x32xf32> to vector<1x32xf32>
    %213 = vector.broadcast %212 : vector<1x32xf32> to vector<8x32xf32>
    %214 = arith.addf %210, %213 : vector<8x32xf32>
    %cst_117 = arith.constant 0.000000e+00 : f32
    %215 = vector.broadcast %cst_117 : f32 to vector<8x32xf32>
    %216 = arith.maximumf %214, %215 : vector<8x32xf32>
    %217 = arith.addf %173, %216 : vector<8x32xf32>
    %c2_118 = arith.constant 2 : index
    %c0_119 = arith.constant 0 : index
    %c0_120 = arith.constant 0 : index
    %218 = vector.load %arg12[%c2_118, %c0_119, %c0_120] : memref<3x1x32xf32, #tpu.memory_space<vmem>>, vector<1x1x32xf32>
    %219 = vector.shape_cast %218 : vector<1x1x32xf32> to vector<1x32xf32>
    %c2_121 = arith.constant 2 : index
    %c0_122 = arith.constant 0 : index
    %c0_123 = arith.constant 0 : index
    %220 = vector.load %arg13[%c2_121, %c0_122, %c0_123] : memref<3x1x32xf32, #tpu.memory_space<vmem>>, vector<1x1x32xf32>
    %221 = vector.shape_cast %220 : vector<1x1x32xf32> to vector<1x32xf32>
    %cst_124 = arith.constant dense<0.000000e+00> : vector<8xf32>
    %222 = vector.multi_reduction <add>, %217, %cst_124 [1] : vector<8x32xf32> to vector<8xf32>
    %223 = vector.shape_cast %222 : vector<8xf32> to vector<8x1xf32>
    %cst_125 = arith.constant 3.200000e+01 : f32
    %224 = vector.broadcast %cst_125 : f32 to vector<8x1xf32>
    %225 = arith.divf %223, %224 : vector<8x1xf32>
    %226 = vector.broadcast %225 : vector<8x1xf32> to vector<8x32xf32>
    %227 = arith.subf %217, %226 : vector<8x32xf32>
    %228 = arith.mulf %227, %227 : vector<8x32xf32>
    %cst_126 = arith.constant dense<0.000000e+00> : vector<8xf32>
    %229 = vector.multi_reduction <add>, %228, %cst_126 [1] : vector<8x32xf32> to vector<8xf32>
    %230 = vector.shape_cast %229 : vector<8xf32> to vector<8x1xf32>
    %cst_127 = arith.constant 3.200000e+01 : f32
    %231 = vector.broadcast %cst_127 : f32 to vector<8x1xf32>
    %232 = arith.divf %230, %231 : vector<8x1xf32>
    %233 = vector.broadcast %225 : vector<8x1xf32> to vector<8x32xf32>
    %234 = arith.subf %217, %233 : vector<8x32xf32>
    %cst_128 = arith.constant 9.99999974E-6 : f32
    %235 = vector.broadcast %cst_128 : f32 to vector<8x1xf32>
    %236 = arith.addf %232, %235 : vector<8x1xf32>
    %237 = math.rsqrt %236 : vector<8x1xf32>
    %238 = vector.broadcast %237 : vector<8x1xf32> to vector<8x32xf32>
    %239 = arith.mulf %234, %238 : vector<8x32xf32>
    %240 = vector.broadcast %219 : vector<1x32xf32> to vector<8x32xf32>
    %241 = arith.mulf %239, %240 : vector<8x32xf32>
    %242 = vector.broadcast %221 : vector<1x32xf32> to vector<8x32xf32>
    %243 = arith.addf %241, %242 : vector<8x32xf32>
    %c0_129 = arith.constant 0 : index
    %c0_130 = arith.constant 0 : index
    %244 = vector.load %arg14[%c0_129, %c0_130] : memref<1x32xf32, #tpu.memory_space<vmem>>, vector<1x32xf32>
    %245 = vector.broadcast %244 : vector<1x32xf32> to vector<8x32xf32>
    %246 = arith.mulf %243, %245 : vector<8x32xf32>
    %cst_131 = arith.constant dense<0.000000e+00> : vector<8xf32>
    %247 = vector.multi_reduction <add>, %246, %cst_131 [1] : vector<8x32xf32> to vector<8xf32>
    %248 = vector.shape_cast %247 : vector<8xf32> to vector<8x1xf32>
    %c0_132 = arith.constant 0 : index
    %c0_133 = arith.constant 0 : index
    %249 = vector.load %arg15[%c0_132, %c0_133] : memref<1x1xf32, #tpu.memory_space<vmem>>, vector<1x1xf32>
    %250 = vector.broadcast %249 : vector<1x1xf32> to vector<8x1xf32>
    %251 = arith.addf %248, %250 : vector<8x1xf32>
    %cst_134 = arith.constant 0.000000e+00 : f32
    %252 = vector.broadcast %cst_134 : f32 to vector<8x1xf32>
    %253 = arith.subf %252, %251 : vector<8x1xf32>
    %254 = math.exp %253 : vector<8x1xf32>
    %cst_135 = arith.constant 1.000000e+00 : f32
    %255 = vector.broadcast %cst_135 : f32 to vector<8x1xf32>
    %256 = arith.addf %255, %254 : vector<8x1xf32>
    %257 = tpu.reciprocal %256 {approx = true} : vector<8x1xf32> -> vector<8x1xf32>
    %c0_136 = arith.constant 0 : index
    %c0_137 = arith.constant 0 : index
    %258 = vector.load %arg16[%c0_136, %c0_137] : memref<8x1xf32, #tpu.memory_space<vmem>>, vector<8x1xf32>
    tpu.vector_store %arg16[%c0_136, %c0_137], %257 {strides = array<i32>} : memref<8x1xf32, #tpu.memory_space<vmem>>, vector<8x1xf32>,
    return
  }
  func.func @transform_0(%arg0: i32) -> (i32, i32) {
    %c0_i32 = arith.constant 0 : i32
    %c0_i32_0 = arith.constant 0 : i32
    return %arg0, %c0_i32 : i32, i32
  }
  func.func @transform_1(%arg0: i32) -> (i32, i32) {
    %c0_i32 = arith.constant 0 : i32
    %c0_i32_0 = arith.constant 0 : i32
    %c0_i32_1 = arith.constant 0 : i32
    return %c0_i32, %c0_i32_0 : i32, i32
  }
  func.func @transform_2(%arg0: i32) -> (i32, i32) {
    %c0_i32 = arith.constant 0 : i32
    %c0_i32_0 = arith.constant 0 : i32
    %c0_i32_1 = arith.constant 0 : i32
    return %c0_i32, %c0_i32_0 : i32, i32
  }
  func.func @transform_3(%arg0: i32) -> (i32, i32) {
    %c0_i32 = arith.constant 0 : i32
    %c0_i32_0 = arith.constant 0 : i32
    %c0_i32_1 = arith.constant 0 : i32
    return %c0_i32, %c0_i32_0 : i32, i32
  }
  func.func @transform_4(%arg0: i32) -> (i32, i32) {
    %c0_i32 = arith.constant 0 : i32
    %c0_i32_0 = arith.constant 0 : i32
    %c0_i32_1 = arith.constant 0 : i32
    return %c0_i32, %c0_i32_0 : i32, i32
  }
  func.func @transform_5(%arg0: i32) -> (i32, i32, i32) {
    %c0_i32 = arith.constant 0 : i32
    %c0_i32_0 = arith.constant 0 : i32
    %c0_i32_1 = arith.constant 0 : i32
    %c0_i32_2 = arith.constant 0 : i32
    return %c0_i32, %c0_i32_0, %c0_i32_1 : i32, i32, i32
  }
  func.func @transform_6(%arg0: i32) -> (i32, i32, i32) {
    %c0_i32 = arith.constant 0 : i32
    %c0_i32_0 = arith.constant 0 : i32
    %c0_i32_1 = arith.constant 0 : i32
    %c0_i32_2 = arith.constant 0 : i32
    return %c0_i32, %c0_i32_0, %c0_i32_1 : i32, i32, i32
  }
  func.func @transform_7(%arg0: i32) -> (i32, i32, i32) {
    %c0_i32 = arith.constant 0 : i32
    %c0_i32_0 = arith.constant 0 : i32
    %c0_i32_1 = arith.constant 0 : i32
    %c0_i32_2 = arith.constant 0 : i32
    return %c0_i32, %c0_i32_0, %c0_i32_1 : i32, i32, i32
  }
  func.func @transform_8(%arg0: i32) -> (i32, i32, i32) {
    %c0_i32 = arith.constant 0 : i32
    %c0_i32_0 = arith.constant 0 : i32
    %c0_i32_1 = arith.constant 0 : i32
    %c0_i32_2 = arith.constant 0 : i32
    return %c0_i32, %c0_i32_0, %c0_i32_1 : i32, i32, i32
  }
  func.func @transform_9(%arg0: i32) -> (i32, i32, i32) {
    %c0_i32 = arith.constant 0 : i32
    %c0_i32_0 = arith.constant 0 : i32
    %c0_i32_1 = arith.constant 0 : i32
    %c0_i32_2 = arith.constant 0 : i32
    return %c0_i32, %c0_i32_0, %c0_i32_1 : i32, i32, i32
  }
  func.func @transform_10(%arg0: i32) -> (i32, i32, i32) {
    %c0_i32 = arith.constant 0 : i32
    %c0_i32_0 = arith.constant 0 : i32
    %c0_i32_1 = arith.constant 0 : i32
    %c0_i32_2 = arith.constant 0 : i32
    return %c0_i32, %c0_i32_0, %c0_i32_1 : i32, i32, i32
  }
  func.func @transform_11(%arg0: i32) -> (i32, i32, i32) {
    %c0_i32 = arith.constant 0 : i32
    %c0_i32_0 = arith.constant 0 : i32
    %c0_i32_1 = arith.constant 0 : i32
    %c0_i32_2 = arith.constant 0 : i32
    return %c0_i32, %c0_i32_0, %c0_i32_1 : i32, i32, i32
  }
  func.func @transform_12(%arg0: i32) -> (i32, i32, i32) {
    %c0_i32 = arith.constant 0 : i32
    %c0_i32_0 = arith.constant 0 : i32
    %c0_i32_1 = arith.constant 0 : i32
    %c0_i32_2 = arith.constant 0 : i32
    return %c0_i32, %c0_i32_0, %c0_i32_1 : i32, i32, i32
  }
  func.func @transform_13(%arg0: i32) -> (i32, i32) {
    %c0_i32 = arith.constant 0 : i32
    %c0_i32_0 = arith.constant 0 : i32
    %c0_i32_1 = arith.constant 0 : i32
    return %c0_i32, %c0_i32_0 : i32, i32
  }
  func.func @transform_14(%arg0: i32) -> (i32, i32) {
    %c0_i32 = arith.constant 0 : i32
    %c0_i32_0 = arith.constant 0 : i32
    %c0_i32_1 = arith.constant 0 : i32
    return %c0_i32, %c0_i32_0 : i32, i32
  }
  func.func @transform_15(%arg0: i32) -> (i32, i32) {
    %c0_i32 = arith.constant 0 : i32
    %c0_i32_0 = arith.constant 0 : i32
    return %arg0, %c0_i32 : i32, i32
  }
}

</mosaic_0001>

<bundles_post_ra>
// kernel: tpu_custom_call.1
= control target key start
LH: loop header
LB: loop body
LE: loop exit
PB: predicated region body
PF: predicated region fallthrough
CT: control target
= control target key end

     0   :  { %s2518_s0 = inlined_call_operand.hbm [shape: f32[8,16], index: 0, kind: input, shape index: {}]   ;;  %s2519_s1 = inlined_call_operand.hbm [shape: f32[16,32], index: 1, kind: input, shape index: {}]   ;;  %s2520_s2 = inlined_call_operand.hbm [shape: f32[1,32], index: 2, kind: input, shape index: {}]   ;;  %s2521_s3 = inlined_call_operand.hbm [shape: f32[1,32], index: 3, kind: input, shape index: {}]   ;;  %s2522_s4 = inlined_call_operand.vmem [shape: f32[1,32], index: 4, kind: input, shape index: {}]   ;;  %s2523_s5 = inlined_call_operand.hbm [shape: f32[3,32,96], index: 5, kind: input, shape index: {}]   ;;  %s2524_s6 = inlined_call_operand.vmem [shape: f32[3,1,96], index: 6, kind: input, shape index: {}]   ;;  %s2525_s7 = inlined_call_operand.hbm [shape: f32[3,32,32], index: 7, kind: input, shape index: {}]   ;;  %s2526_s8 = inlined_call_operand.vmem [shape: f32[3,1,32], index: 8, kind: input, shape index: {}]   ;;  %s2527_s9 = inlined_call_operand.hbm [shape: f32[3,32,32], index: 9, kind: input, shape index: {}]   ;;  %s2528_s10 = inlined_call_operand.vmem [shape: f32[3,1,32], index: 10, kind: input, shape index: {}]   ;;  %s2529_s11 = inlined_call_operand.vmem [shape: f32[3,1,32], index: 11, kind: input, shape index: {}]   ;;  %s2530_s12 = inlined_call_operand.vmem [shape: f32[3,1,32], index: 12, kind: input, shape index: {}]   ;;  %s2531_s13 = inlined_call_operand.vmem [shape: f32[1,32], index: 13, kind: input, shape index: {}]   ;;  %s2532_s14 = inlined_call_operand.<no memory space> [shape: f32[1,1], index: 14, kind: input, shape index: {}]   ;;  %s2533_s15 = inlined_call_operand.vmem [shape: f32[8,1], index: 15, kind: output, shape index: {}]  }
   0x1   :  { %v20_v0 = vstv %s2532_s14 }
   0x2   :  { %21 = vst [vmem:[#allocation2] sm:$0x1] %v20_v0 }
   0x3   :  { %22 = vsyncpa [#allocation4], 0 }
   0x4   :  { %23 = vsyncpa [#allocation6], 0 }
   0x5   :  { %24 = vsyncpa [#allocation9], 0 }
   0x6   :  { %25 = vsyncpa [#allocation12], 0  ;;  %s2160_s20 = smov [#allocation5]   ;;  %s1998_s24 = scalar_lea.hbm %s2519_s1, 256 }
   0x7   :  { %s41_s21 = sshll.u32 %s2160_s20, 4  ;;  %p1999_p0 = scmp.ne.s32.totalorder %s2519_s1, %s1998_s24  ;;  %s42_s21 = int_to_ptr.vmem [resolvable:$true] %s41_s21 }
   0x8   :  { %p2002_p1 = scmp.lt.u32.totalorder %s1998_s24, %s2519_s1 }
   0xa   :  { %p2004_p2 = pnand %p2002_p1, %p1999_p0 }
   0xc   :  { %2007 = shalt.err (!%p2004_p2)
}
   0xd   :  { %s2008_s14 = scalar_lea.vmem %s42_s21, 256  ;;  %p2013_p4 = scmp.lt.s32.totalorder %s42_s21, %s42_s21 }
   0xe   :  { %p2009_p3 = scmp.ne.s32.totalorder %s42_s21, %s2008_s14  ;;  %p2014_p5 = scmp.lt.s32.totalorder %s2008_s14, %s2008_s14 }
  0x10   :  { %p2015_p6 = por %p2014_p5, %p2013_p4 }
  0x12   :  { %p2016_p7 = pnand %p2015_p6, %p2009_p3 }
  0x14   :  { %2019 = shalt.err (!%p2016_p7)
}
  0x15   :  { %s2161_s29 = smov 128   ;;  %s2162_s30 = smov 8  }
  0x16   :  { %47 = dma.hbm_to_vmem [thread:$0]  %s2519_s1, 256, %s42_s21, [#allocation6], %s2161_s29, %s2161_s29, %s2162_s30  }
  0x17   :  { %s2163_s18 = smov [#allocation8]   ;;  %s2164_s20 = smov [#allocation11]  }
  0x18   :  { %s64_s19 = sshll.u32 %s2163_s18, 4  ;;  %s89_s22 = sshll.u32 %s2164_s20, 4  ;;  %s65_s19 = int_to_ptr.vmem [resolvable:$true] %s64_s19  ;;  %s90_s22 = int_to_ptr.vmem [resolvable:$true] %s89_s22 }
  0x19   :  { %s2020_s25 = scalar_lea.hbm %s2521_s3, 16 }
  0x1a   :  { %p2021_p8 = scmp.ne.s32.totalorder %s2521_s3, %s2020_s25  ;;  %p2024_p9 = scmp.lt.u32.totalorder %s2020_s25, %s2521_s3 }
  0x1c   :  { %p2026_p10 = pnand %p2024_p9, %p2021_p8 }
  0x1e   :  { %2029 = shalt.err (!%p2026_p10)
}
  0x1f   :  { %s2030_s1 = scalar_lea.vmem %s65_s19, 16  ;;  %s2034_s21 = scalar_lea.vmem %s65_s19, 32 }
  0x20   :  { %p2031_p11 = scmp.ne.s32.totalorder %s65_s19, %s2030_s1  ;;  %p2035_p12 = scmp.lt.s32.totalorder %s65_s19, %s65_s19 }
  0x21   :  { %p2036_p13 = scmp.lt.s32.totalorder %s2034_s21, %s2030_s1 }
  0x23   :  { %p2037_p0 = por %p2036_p13, %p2035_p12 }
  0x25   :  { %p2038_p1 = pnand %p2037_p0, %p2031_p11 }
  0x27   :  { %2041 = shalt.err (!%p2038_p1)
}
  0x28   :  { %67 = dma.hbm_to_vmem [thread:$0]  %s2521_s3, 16, %s65_s19, [#allocation9]  }
  0x29   :  { %s2042_s23 = scalar_lea.hbm %s2525_s7, 1536 }
  0x2a   :  { %p2043_p2 = scmp.ne.s32.totalorder %s2525_s7, %s2042_s23  ;;  %p2046_p3 = scmp.lt.u32.totalorder %s2042_s23, %s2525_s7 }
  0x2c   :  { %p2048_p4 = pnand %p2046_p3, %p2043_p2 }
  0x2e   :  { %2051 = shalt.err (!%p2048_p4)
}
  0x2f   :  { %s2052_s28 = scalar_lea.vmem %s90_s22, 1536  ;;  %p2057_p6 = scmp.lt.s32.totalorder %s90_s22, %s90_s22 }
  0x30   :  { %p2053_p5 = scmp.ne.s32.totalorder %s90_s22, %s2052_s28  ;;  %p2058_p7 = scmp.lt.s32.totalorder %s2052_s28, %s2052_s28 }
  0x32   :  { %p2059_p8 = por %p2058_p7, %p2057_p6 }
  0x34   :  { %p2060_p9 = pnand %p2059_p8, %p2053_p5 }
  0x36   :  { %2063 = shalt.err (!%p2060_p9)
}
  0x37   :  { %95 = dma.hbm_to_vmem [thread:$0]  %s2525_s7, 1536, %s90_s22, [#allocation12], %s2161_s29, %s2161_s29, %s2162_s30  }
  0x38   :  { %s2165_s14 = smov [#allocation3]   ;;  %s2166_s21 = smov [#allocation7]  }
  0x39   :  { %s32_s1 = sshll.u32 %s2165_s14, 4  ;;  %s54_s16 = sshll.u32 %s2166_s21, 4  ;;  %s33_s1 = int_to_ptr.vmem [resolvable:$true] %s32_s1  ;;  %s55_s16 = int_to_ptr.vmem [resolvable:$true] %s54_s16 }
  0x3a   :  { %s2064_s20 = scalar_lea.hbm %s2518_s0, 128 }
  0x3b   :  { %p2065_p10 = scmp.ne.s32.totalorder %s2518_s0, %s2064_s20  ;;  %p2068_p11 = scmp.lt.u32.totalorder %s2064_s20, %s2518_s0 }
  0x3d   :  { %p2070_p12 = pnand %p2068_p11, %p2065_p10 }
  0x3f   :  { %2073 = shalt.err (!%p2070_p12)
}
  0x40   :  { %s2074_s7 = scalar_lea.vmem %s33_s1, 128  ;;  %p2079_p0 = scmp.lt.s32.totalorder %s33_s1, %s33_s1 }
  0x41   :  { %p2075_p13 = scmp.ne.s32.totalorder %s33_s1, %s2074_s7  ;;  %p2080_p1 = scmp.lt.s32.totalorder %s2074_s7, %s2074_s7 }
  0x43   :  { %p2081_p2 = por %p2080_p1, %p2079_p0 }
  0x45   :  { %p2082_p3 = pnand %p2081_p2, %p2075_p13 }
  0x47   :  { %2085 = shalt.err (!%p2082_p3)
}
  0x48   :  { %35 = dma.hbm_to_vmem [thread:$0]  %s2518_s0, 128, %s33_s1, [#allocation4]  }
  0x49   :  { %s2086_s19 = scalar_lea.hbm %s2520_s2, 16 }
  0x4a   :  { %p2087_p4 = scmp.ne.s32.totalorder %s2520_s2, %s2086_s19  ;;  %p2090_p5 = scmp.lt.u32.totalorder %s2086_s19, %s2520_s2 }
  0x4c   :  { %p2092_p6 = pnand %p2090_p5, %p2087_p4 }
  0x4e   :  { %2095 = shalt.err (!%p2092_p6)
}
  0x4f   :  { %s2096_s20 = scalar_lea.vmem %s55_s16, 16  ;;  %s2100_s23 = scalar_lea.vmem %s55_s16, 32 }
  0x50   :  { %p2097_p7 = scmp.ne.s32.totalorder %s55_s16, %s2096_s20  ;;  %p2101_p8 = scmp.lt.s32.totalorder %s55_s16, %s55_s16 }
  0x51   :  { %p2102_p9 = scmp.lt.s32.totalorder %s2100_s23, %s2096_s20 }
  0x53   :  { %p2103_p10 = por %p2102_p9, %p2101_p8 }
  0x55   :  { %p2104_p11 = pnand %p2103_p10, %p2097_p7 }
  0x57   :  { %2107 = shalt.err (!%p2104_p11)
}
  0x58   :  { %57 = dma.hbm_to_vmem [thread:$0]  %s2520_s2, 16, %s55_s16, [#allocation6]  }
  0x59   :  { %s2167_s24 = smov [#allocation10]   ;;  %s2168_s26 = smov [#allocation13]  }
  0x5a   :  { %s75_s25 = sshll.u32 %s2167_s24, 4  ;;  %s103_s7 = sshll.u32 %s2168_s26, 4  ;;  %s76_s25 = int_to_ptr.vmem [resolvable:$true] %s75_s25  ;;  %s104_s7 = int_to_ptr.vmem [resolvable:$true] %s103_s7 }
  0x5b   :  { %s2108_s28 = scalar_lea.hbm %s2523_s5, 1536 }
  0x5c   :  { %p2109_p12 = scmp.ne.s32.totalorder %s2523_s5, %s2108_s28  ;;  %p2112_p13 = scmp.lt.u32.totalorder %s2108_s28, %s2523_s5 }
  0x5e   :  { %p2114_p0 = pnand %p2112_p13, %p2109_p12 }
  0x60   :  { %2117 = shalt.err (!%p2114_p0)
}
  0x61   :  { %s2118_s2 = scalar_lea.vmem %s76_s25, 1536  ;;  %p2123_p2 = scmp.lt.s32.totalorder %s76_s25, %s76_s25 }
  0x62   :  { %p2119_p1 = scmp.ne.s32.totalorder %s76_s25, %s2118_s2  ;;  %p2124_p3 = scmp.lt.s32.totalorder %s2118_s2, %s2118_s2 }
  0x64   :  { %p2125_p4 = por %p2124_p3, %p2123_p2 }
  0x66   :  { %p2126_p5 = pnand %p2125_p4, %p2119_p1 }
  0x68   :  { %2129 = shalt.err (!%p2126_p5)
}
  0x69   :  { %81 = dma.hbm_to_vmem [thread:$0]  %s2523_s5, 1536, %s76_s25, [#allocation9], %s2161_s29, %s2161_s29, %s2162_s30  }
  0x6a   :  { %s2130_s23 = scalar_lea.hbm %s2527_s9, 1536 }
  0x6b   :  { %p2131_p6 = scmp.ne.s32.totalorder %s2527_s9, %s2130_s23  ;;  %p2134_p7 = scmp.lt.u32.totalorder %s2130_s23, %s2527_s9 }
  0x6d   :  { %p2136_p8 = pnand %p2134_p7, %p2131_p6 }
  0x6f   :  { %2139 = shalt.err (!%p2136_p8)
}
  0x70   :  { %s2140_s22 = scalar_lea.vmem %s104_s7, 1536  ;;  %p2145_p10 = scmp.lt.s32.totalorder %s104_s7, %s104_s7 }
  0x71   :  { %p2141_p9 = scmp.ne.s32.totalorder %s104_s7, %s2140_s22  ;;  %p2146_p11 = scmp.lt.s32.totalorder %s2140_s22, %s2140_s22 }
  0x73   :  { %p2147_p12 = por %p2146_p11, %p2145_p10 }
  0x75   :  { %p2148_p13 = pnand %p2147_p12, %p2141_p9 }
  0x77   :  { %2151 = shalt.err (!%p2148_p13)
}
  0x78   :  { %109 = dma.hbm_to_vmem [thread:$0]  %s2527_s9, 1536, %s104_s7, [#allocation12], %s2161_s29, %s2161_s29, %s2162_s30  }
  0x79   :  { %2152 = dma.done.wait [#allocation4], 128  }
  0x7a   :  { %2153 = vsyncadd [#allocation4], 4294967168 }
  0x7b   :  { %2154 = dma.done.wait [#allocation6], 272  }
  0x7c   :  { %2155 = vsyncadd [#allocation6], 4294967024 }
  0x7d   :  { %2156 = dma.done.wait [#allocation9], 1552  }
  0x7e   :  { %2157 = vsyncadd [#allocation9], 4294965744 }
  0x7f   :  { %2158 = dma.done.wait [#allocation12], 3072  }
  0x80   :  { %2159 = vsyncadd [#allocation12], 4294964224  ;;  %v2169_v1 = vmov 0.0|0.0   ;;  %vm2170_vm0 = vmmov 0   ;;  %v2171_v2 = vmov 0.0   ;;  %v142_v3 = vld [vmem:[#allocation5] sm:$0xff] }
  0x81   :  { %1903 = vmatprep.subr.bf16.mxu0 %v2169_v1  ;;  %1771 = vmatprep.mubr.msk.f32.mxu0 %vm2170_vm0, %v2171_v2  ;;  %v143_v4 = vld [vmem:[#allocation5 + $0x8] sm:$0xff]  ;;  %v141_v6 = vld [vmem:[#allocation3] sm:$0xff]  ;;  %vm151_vm1 = vcmask 130048   ;;  %v1658_v7 = vld [vmem:[#allocation7] ss:$0 sm:$0xff]  ;;  %vm228_vm2 = vcmask 261120  }
  0x82   :  { %1906 = vmatprep.subr.bf16.mxu1 %v2169_v1  ;;  %1782 = vmatprep.mubr.msk.f32.mxu1 %vm2170_vm0, %v2171_v2  ;;  %v1904_v5 = vpack.c.bf16 %v143_v4, %v142_v3  ;;  %v257_v18 = vld [vmem:[#allocation10] sm:$0xff]  ;;  %v258_v19 = vld [vmem:[#allocation10 + $0x8] sm:$0xff]  ;;  %v259_v20 = vld [vmem:[#allocation10 + $0x10] sm:$0xff]  ;;  %s2172_s27 = smov 96   ;;  %vm419_vm3 = vcmask 64512   ;;  %vm1648_vm4 = vcmask 7168  }
  0x83   :  { %v1907_v21 = vpack.c.bf16 %v258_v19, %v257_v18  ;;  %v260_v22 = vld [vmem:[#allocation10 + $0x18] sm:$0xff]  ;;  %v1661_v30 = vld [vmem:[%s2522_s4] ss:$0 sm:$0xff]  ;;  %s2173_s4 = smov 64   ;;  %v508_v48 = vld [vmem:[#allocation11 + $0x8] sm:$0xff] }
  0x84   :  { %1905 = vmatpush3.bf16.msra.mxu0 %v1904_v5  ;;  %v1910_v23 = vpack.c.bf16 %v260_v22, %v259_v20  ;;  %v1660_v28 = vld [vmem:[#allocation8] ss:$0 sm:$0xff]  ;;  %v1662_v33 = vld [vmem:[%s2524_s6] ss:$0 sm:$0xff]  ;;  %v509_v49 = vld [vmem:[#allocation11 + $0x10] sm:$0xff] }
  0x85   :  { %1785 = vmatprep.subr.mxu0 %v2171_v2  ;;  %1908 = vmatpush3.bf16.msra.mxu1 %v1907_v21  ;;  %v507_v47 = vld [vmem:[#allocation11] sm:$0xff]  ;;  %v510_v51 = vld [vmem:[#allocation11 + $0x18] sm:$0xff]  ;;  %v594_v60 = vld [vmem:[#allocation13 + $0x8] sm:$0xff] }
  0x86   :  { %1909 = vmatprep.subr.bf16.mxu1 %v2169_v1  ;;  %v1913_v50 = vpack.c.bf16 %v508_v48, %v507_v47  ;;  %v1916_v52 = vpack.c.bf16 %v510_v51, %v509_v49  ;;  %v593_v59 = vld [vmem:[#allocation13] sm:$0xff]  ;;  %v595_v62 = vld [vmem:[#allocation13 + $0x10] sm:$0xff]  ;;  %v596_v63 = vld [vmem:[#allocation13 + $0x18] sm:$0xff] }
  0x87   :  { %1772 = vmatmul.mubr.msk.f32.vlgmr.msra.gmra.mrb[0].mxu0 %vm151_vm1, %v141_v6  ;;  %v1919_v61 = vpack.c.bf16 %v594_v60, %v593_v59  ;;  %v1922_v0 = vpack.c.bf16 %v596_v63, %v595_v62  ;;  %v1667_v3 = vld [vmem:[%s2526_s8] ss:$0 sm:$0xff]  ;;  %v710_v22 = vld [vmem:[#allocation10 + $0x28] sm:$0xff] }
  0x88   :  { %1787 = vmatprep.mubr.msk.f32.mxu0 %vm2170_vm0, %v2171_v2  ;;  %v709_v21 = vld [vmem:[#allocation10 + $0x20] sm:$0xff]  ;;  %v961_v51 = vld [vmem:[#allocation11 + $0x28] sm:$0xff] }
  0x89   :  { %1911 = vmatpush3.bf16.msra.mxu1 %v1910_v23  ;;  %v1925_v23 = vpack.c.bf16 %v710_v22, %v709_v21  ;;  %v1048_v62 = vld [vmem:[#allocation13 + $0x20] sm:$0xff]  ;;  %v1049_v63 = vld [vmem:[#allocation13 + $0x28] sm:$0xff] }
  0x8a   :  { %1912 = vmatprep.subr.bf16.mxu1 %v2169_v1 }
 0x15a   :  { %v221_v8 = vpop.f32.mrb[0].mxu0 }
 0x15b   :  { %v222_v9 = vadd.f32 %v1658_v7, %v221_v8  ;;  %v1773_v10 = vpop.f32.mrb[1].mxu0 }
 0x15d   :  { %v225_v11 = vmax.f32 %v222_v9, 0.0  ;;  %v1669_v9 = vld [vmem:[%s2528_s10] ss:$0 sm:$0xff] }
 0x15f   :  { %v229_v12 = vsel %vm228_vm2, %v225_v11, 0.0 }
 0x160   :  { %230 = vadd.xlane.f32.xlu0 %v229_v12 }
 0x1ed   :  { %v231_v13 = vpop.xlane.xlu0 %230 }
 0x1ee   :  { %v233_v14 = vmul.f32 0.03125, %v231_v13 }
 0x1f0   :  { %v234_v15 = vsub.f32 %v225_v11, %v233_v14 }
 0x1f2   :  { %v235_v16 = vmul.f32 %v234_v15, %v234_v15 }
 0x1f4   :  { %v236_v17 = vsel %vm228_vm2, %v235_v16, 0.0 }
 0x1f5   :  { %237 = vadd.xlane.f32.xlu0 %v236_v17 }
 0x282   :  { %v238_v24 = vpop.xlane.xlu0 %237 }
 0x283   :  { %v239_v25 = vmul.f32 0.03125, %v238_v24  ;;  %v711_v24 = vld [vmem:[#allocation10 + $0x30] sm:$0xff] }
 0x285   :  { %v240_v26 = vadd.f32 1e-05, %v239_v25  ;;  %v712_v25 = vld [vmem:[#allocation10 + $0x38] sm:$0xff] }
 0x287   :  { %1974 = vrsqrt.f32 %v240_v26  ;;  %v1928_v26 = vpack.c.bf16 %v712_v25, %v711_v24  ;;  %v1167_v24 = vld [vmem:[#allocation10 + $0x40] sm:$0xff]  ;;  %v1168_v25 = vld [vmem:[#allocation10 + $0x48] sm:$0xff] }
 0x291   :  { %v1975_v27 = vpop.eup %1974 }
 0x292   :  { %v242_v29 = vmul.f32 %v1975_v27, %v234_v15 }
 0x294   :  { %v249_v31 = vmul.f32 %v1660_v28, %v242_v29 }
 0x296   :  { %v2369_v32 = vadd.f32 %v1661_v30, %v249_v31  ;;  %v1671_v31 = vld [vmem:[%s2529_s11] ss:$0 sm:$0xff] }
 0x298   :  { %1783 = vmatmul.mubr.msk.f32.vlgmr.msra.gmra.mrb[0].mxu1 %vm228_vm2, %v2369_v32 }
 0x299   :  { %1803 = vmatprep.mubr.msk.f32.mxu1 %vm2170_vm0, %v2171_v2  ;;  %1914 = vmatpush3.bf16.msra.mxu1 %v1913_v50  ;;  %v960_v50 = vld [vmem:[#allocation11 + $0x20] sm:$0xff] }
 0x29a   :  { %1915 = vmatprep.subr.bf16.mxu1 %v2169_v1 }
 0x29d   :  { %1917 = vmatpush3.bf16.msra.mxu1 %v1916_v52  ;;  %v962_v52 = vld [vmem:[#allocation11 + $0x30] sm:$0xff] }
 0x29e   :  { %1924 = vmatprep.subr.bf16.mxu1 %v2169_v1 }
 0x36b   :  { %v337_v34 = vpop.f32.mrb[0].mxu1 }
 0x36c   :  { %v338_v35 = vadd.f32 %v1662_v33, %v337_v34  ;;  %v1784_v36 = vpop.f32.mrb[1].mxu1  ;;  %v1672_v33 = vld [vmem:[%s2530_s12] ss:$0 sm:$0xff] }
 0x36d   :  { %v1674_v36 = vld [vmem:[%s2524_s6 + $0x1] ss:$0 sm:$0xff] }
 0x36e   :  { %342 = vrot.lane.b32.xlu1 %v338_v35, %s2172_s27 }
 0x3e0   :  { %v343_v37 = vpop.permute.xlu1 %342 }
 0x3e1   :  { %1786 = vmatpush3.xpose.msk.msra.mxu0 %vm228_vm2, %v343_v37 }
 0x3e2   :  { %1790 = vmatprep.subr.mxu0 %v2171_v2 }
 0x3e4   :  { %1788 = vmatmul.mubr.msk.f32.vlgmr.msra.gmra.mrb[2].mxu0 %vm228_vm2, %v338_v35 }
 0x3e5   :  { %1792 = vmatprep.mubr.msk.f32.mxu0 %vm2170_vm0, %v2171_v2 }
 0x4b7   :  { %v414_v38 = vpop.f32.mrb[2].mxu0 }
 0x4b8   :  { %v418_v39 = vmul.f32 0.17677669, %v414_v38  ;;  %v1789_v40 = vpop.f32.mrb[3].mxu0 }
 0x4ba   :  { %v420_v41 = vsel %vm419_vm3, %v418_v39, -inf }
 0x4bb   :  { %421 = vmax.xlane.f32.xlu1 %v420_v41 }
 0x548   :  { %v422_v42 = vpop.xlane.xlu1 %421 }
 0x549   :  { %v423_v43 = vsub.f32 %v418_v39, %v422_v42 }
 0x54b   :  { %v424_v44 = vmul.f32 1.442695, %v423_v43 }
 0x54d   :  { %1976 = vpow2.f32 %v424_v44 }
 0x557   :  { %v1977_v45 = vpop.eup %1976 }
 0x558   :  { %v426_v46 = vsel %vm419_vm3, %v1977_v45, 0.0 }
 0x559   :  { %427 = vadd.xlane.f32.xlu0 %v426_v46 }
 0x56f   :  { %431 = vrot.lane.b32.xlu0 %v338_v35, %s2173_s4 }
 0x5e6   :  { %v428_v53 = vpop.xlane.xlu0 %427 }
 0x5e7   :  { %1978 = vrcp.f32 %v428_v53  ;;  %v1931_v53 = vpack.c.bf16 %v961_v51, %v960_v50 }
 0x5ea   :  { %v432_v54 = vpop.permute.xlu0 %431 }
 0x5eb   :  { %1791 = vmatpush3.msra.mxu0 %v432_v54  ;;  %v963_v54 = vld [vmem:[#allocation11 + $0x38] sm:$0xff] }
 0x5ec   :  { %1918 = vmatprep.subr.bf16.mxu0 %v2169_v1 }
 0x5f1   :  { %v1979_v55 = vpop.eup %1978 }
 0x5f2   :  { %v430_v56 = vmul.f32 %v1979_v55, %v1977_v45  ;;  %v1934_v55 = vpack.c.bf16 %v963_v54, %v962_v52  ;;  %v1419_v54 = vld [vmem:[#allocation11 + $0x48] sm:$0xff] }
 0x5f4   :  { %1793 = vmatmul.mubr.msk.f32.vlgmr.msra.gmra.mrb[4].mxu0 %vm419_vm3, %v430_v56 }
 0x5f5   :  { %1814 = vmatprep.mubr.msk.f32.mxu0 %vm2170_vm0, %v2171_v2  ;;  %1920 = vmatpush3.bf16.msra.mxu0 %v1919_v61 }
 0x5f6   :  { %1921 = vmatprep.subr.bf16.mxu0 %v2169_v1 }
 0x5f9   :  { %1923 = vmatpush3.bf16.msra.mxu0 %v1922_v0  ;;  %v1937_v0 = vpack.c.bf16 %v1049_v63, %v1048_v62 }
 0x5fa   :  { %1828 = vmatprep.subr.mxu0 %v2171_v2 }
 0x6c7   :  { %v503_v57 = vpop.f32.mrb[4].mxu0 }
 0x6c8   :  { %v1794_v58 = vpop.f32.mrb[5].mxu0  ;;  %1804 = vmatmul.mubr.msk.f32.vlgmr.msra.gmra.mrb[2].mxu1 %vm228_vm2, %v503_v57 }
 0x6c9   :  { %1825 = vmatprep.mubr.msk.f32.mxu1 %vm2170_vm0, %v2171_v2  ;;  %1926 = vmatpush3.bf16.msra.mxu1 %v1925_v23 }
 0x6ca   :  { %1927 = vmatprep.subr.bf16.mxu1 %v2169_v1 }
 0x6cd   :  { %1929 = vmatpush3.bf16.msra.mxu1 %v1928_v26  ;;  %v1943_v26 = vpack.c.bf16 %v1168_v25, %v1167_v24 }
 0x6ce   :  { %1930 = vmatprep.subr.bf16.mxu1 %v2169_v1 }
 0x79b   :  { %v587_v4 = vpop.f32.mrb[2].mxu1 }
 0x79c   :  { %v588_v5 = vadd.f32 %v1667_v3, %v587_v4  ;;  %v1805_v6 = vpop.f32.mrb[3].mxu1  ;;  %v1050_v3 = vld [vmem:[#allocation13 + $0x30] sm:$0xff]  ;;  %v1051_v4 = vld [vmem:[#allocation13 + $0x38] sm:$0xff] }
 0x79d   :  { %v1680_v6 = vld [vmem:[%s2526_s8 + $0x1] ss:$0 sm:$0xff] }
 0x79e   :  { %v591_v7 = vmax.f32 %v588_v5, 0.0  ;;  %v1940_v5 = vpack.c.bf16 %v1051_v4, %v1050_v3  ;;  %v1506_v3 = vld [vmem:[#allocation13 + $0x40] sm:$0xff]  ;;  %v1507_v4 = vld [vmem:[#allocation13 + $0x48] sm:$0xff] }
 0x7a0   :  { %v592_v8 = vmul.f32 %v591_v7, %v2369_v32 }
 0x7a2   :  { %1815 = vmatmul.mubr.msk.f32.vlgmr.msra.gmra.mrb[6].mxu0 %vm228_vm2, %v592_v8 }
 0x7a3   :  { %1830 = vmatprep.mubr.msk.f32.mxu0 %vm2170_vm0, %v2171_v2 }
 0x875   :  { %v673_v10 = vpop.f32.mrb[6].mxu0 }
 0x876   :  { %v674_v11 = vadd.f32 %v1669_v9, %v673_v10  ;;  %v1816_v12 = vpop.f32.mrb[7].mxu0 }
 0x877   :  { %v1683_v12 = vld [vmem:[%s2528_s10 + $0x1] ss:$0 sm:$0xff] }
 0x878   :  { %v677_v13 = vmax.f32 %v674_v11, 0.0 }
 0x87a   :  { %v678_v14 = vadd.f32 %v677_v13, %v2369_v32 }
 0x87c   :  { %v681_v15 = vsel %vm228_vm2, %v678_v14, 0.0 }
 0x87d   :  { %682 = vadd.xlane.f32.xlu0 %v681_v15 }
 0x90a   :  { %v683_v16 = vpop.xlane.xlu0 %682 }
 0x90b   :  { %v684_v17 = vmul.f32 0.03125, %v683_v16 }
 0x90d   :  { %v685_v18 = vsub.f32 %v678_v14, %v684_v17 }
 0x90f   :  { %v686_v19 = vmul.f32 %v685_v18, %v685_v18 }
 0x911   :  { %v687_v20 = vsel %vm228_vm2, %v686_v19, 0.0 }
 0x912   :  { %688 = vadd.xlane.f32.xlu1 %v687_v20 }
 0x99f   :  { %v689_v27 = vpop.xlane.xlu1 %688 }
 0x9a0   :  { %v690_v28 = vmul.f32 0.03125, %v689_v27  ;;  %v1169_v27 = vld [vmem:[#allocation10 + $0x50] sm:$0xff] }
 0x9a2   :  { %v691_v29 = vadd.f32 1e-05, %v690_v28  ;;  %v1170_v28 = vld [vmem:[#allocation10 + $0x58] sm:$0xff] }
 0x9a4   :  { %1980 = vrsqrt.f32 %v691_v29  ;;  %v1946_v29 = vpack.c.bf16 %v1170_v28, %v1169_v27 }
 0x9ae   :  { %v1981_v30 = vpop.eup %1980 }
 0x9af   :  { %v693_v32 = vmul.f32 %v1981_v30, %v685_v18 }
 0x9b1   :  { %v700_v34 = vmul.f32 %v1671_v31, %v693_v32 }
 0x9b3   :  { %v2419_v35 = vadd.f32 %v1672_v33, %v700_v34  ;;  %v1687_v34 = vld [vmem:[%s2529_s11 + $0x1] ss:$0 sm:$0xff] }
 0x9b5   :  { %1826 = vmatmul.mubr.msk.f32.vlgmr.msra.gmra.mrb[4].mxu1 %vm228_vm2, %v2419_v35 }
 0x9b6   :  { %1846 = vmatprep.mubr.msk.f32.mxu1 %vm2170_vm0, %v2171_v2  ;;  %1932 = vmatpush3.bf16.msra.mxu1 %v1931_v53  ;;  %v1418_v53 = vld [vmem:[#allocation11 + $0x40] sm:$0xff] }
 0x9b7   :  { %1933 = vmatprep.subr.bf16.mxu1 %v2169_v1 }
 0x9ba   :  { %1935 = vmatpush3.bf16.msra.mxu1 %v1934_v55  ;;  %v1420_v55 = vld [vmem:[#allocation11 + $0x50] sm:$0xff] }
 0x9bb   :  { %1942 = vmatprep.subr.bf16.mxu1 %v2169_v1 }
 0xa88   :  { %v790_v37 = vpop.f32.mrb[4].mxu1 }
 0xa89   :  { %v791_v38 = vadd.f32 %v1674_v36, %v790_v37  ;;  %v1827_v39 = vpop.f32.mrb[5].mxu1  ;;  %v1688_v36 = vld [vmem:[%s2530_s12 + $0x1] ss:$0 sm:$0xff] }
 0xa8a   :  { %v1690_v39 = vld [vmem:[%s2524_s6 + $0x2] ss:$0 sm:$0xff] }
 0xa8b   :  { %795 = vrot.lane.b32.xlu1 %v791_v38, %s2172_s27 }
 0xafd   :  { %v796_v40 = vpop.permute.xlu1 %795 }
 0xafe   :  { %1829 = vmatpush3.xpose.msk.msra.mxu0 %vm228_vm2, %v796_v40 }
 0xaff   :  { %1833 = vmatprep.subr.mxu0 %v2171_v2 }
 0xb01   :  { %1831 = vmatmul.mubr.msk.f32.vlgmr.msra.gmra.mrb[8].mxu0 %vm228_vm2, %v791_v38 }
 0xb02   :  { %1835 = vmatprep.mubr.msk.f32.mxu0 %vm2170_vm0, %v2171_v2 }
 0xbd4   :  { %v867_v41 = vpop.f32.mrb[8].mxu0 }
 0xbd5   :  { %v871_v42 = vmul.f32 0.17677669, %v867_v41  ;;  %v1832_v43 = vpop.f32.mrb[9].mxu0 }
 0xbd7   :  { %v872_v44 = vsel %vm419_vm3, %v871_v42, -inf }
 0xbd8   :  { %873 = vmax.xlane.f32.xlu1 %v872_v44 }
 0xc65   :  { %v874_v45 = vpop.xlane.xlu1 %873 }
 0xc66   :  { %v875_v46 = vsub.f32 %v871_v42, %v874_v45 }
 0xc68   :  { %v876_v47 = vmul.f32 1.442695, %v875_v46 }
 0xc6a   :  { %1982 = vpow2.f32 %v876_v47 }
 0xc74   :  { %v1983_v48 = vpop.eup %1982 }
 0xc75   :  { %v878_v49 = vsel %vm419_vm3, %v1983_v48, 0.0 }
 0xc76   :  { %879 = vadd.xlane.f32.xlu0 %v878_v49 }
 0xc8c   :  { %883 = vrot.lane.b32.xlu0 %v791_v38, %s2173_s4 }
 0xd03   :  { %v880_v56 = vpop.xlane.xlu0 %879 }
 0xd04   :  { %1984 = vrcp.f32 %v880_v56  ;;  %v1949_v56 = vpack.c.bf16 %v1419_v54, %v1418_v53 }
 0xd07   :  { %v884_v57 = vpop.permute.xlu0 %883 }
 0xd08   :  { %1834 = vmatpush3.msra.mxu0 %v884_v57  ;;  %v1421_v57 = vld [vmem:[#allocation11 + $0x58] sm:$0xff] }
 0xd09   :  { %1936 = vmatprep.subr.bf16.mxu0 %v2169_v1 }
 0xd0e   :  { %v1985_v58 = vpop.eup %1984 }
 0xd0f   :  { %v882_v59 = vmul.f32 %v1985_v58, %v1983_v48  ;;  %v1952_v58 = vpack.c.bf16 %v1421_v57, %v1420_v55 }
 0xd11   :  { %1836 = vmatmul.mubr.msk.f32.vlgmr.msra.gmra.mrb[10].mxu0 %vm419_vm3, %v882_v59 }
 0xd12   :  { %1857 = vmatprep.mubr.msk.f32.mxu0 %vm2170_vm0, %v2171_v2  ;;  %1938 = vmatpush3.bf16.msra.mxu0 %v1937_v0 }
 0xd13   :  { %1939 = vmatprep.subr.bf16.mxu0 %v2169_v1 }
 0xd16   :  { %1941 = vmatpush3.bf16.msra.mxu0 %v1940_v5  ;;  %v1955_v5 = vpack.c.bf16 %v1507_v4, %v1506_v3 }
 0xd17   :  { %1871 = vmatprep.subr.mxu0 %v2171_v2 }
 0xde4   :  { %v955_v60 = vpop.f32.mrb[10].mxu0 }
 0xde5   :  { %v1837_v61 = vpop.f32.mrb[11].mxu0  ;;  %1847 = vmatmul.mubr.msk.f32.vlgmr.msra.gmra.mrb[6].mxu1 %vm228_vm2, %v955_v60 }
 0xde6   :  { %1868 = vmatprep.mubr.msk.f32.mxu1 %vm2170_vm0, %v2171_v2  ;;  %1944 = vmatpush3.bf16.msra.mxu1 %v1943_v26 }
 0xde7   :  { %1945 = vmatprep.subr.bf16.mxu1 %v2169_v1 }
 0xdea   :  { %1947 = vmatpush3.bf16.msra.mxu1 %v1946_v29  ;;  %v1703_v29 = vld [vmem:[%s2529_s11 + $0x2] ss:$0 sm:$0xff] }
 0xdeb   :  { %1948 = vmatprep.subr.bf16.mxu1 %v2169_v1 }
 0xeb8   :  { %v1041_v7 = vpop.f32.mrb[6].mxu1 }
 0xeb9   :  { %v1042_v8 = vadd.f32 %v1680_v6, %v1041_v7  ;;  %v1848_v9 = vpop.f32.mrb[7].mxu1  ;;  %v1508_v6 = vld [vmem:[#allocation13 + $0x50] sm:$0xff]  ;;  %v1509_v7 = vld [vmem:[#allocation13 + $0x58] sm:$0xff] }
 0xeba   :  { %v1696_v9 = vld [vmem:[%s2526_s8 + $0x2] ss:$0 sm:$0xff] }
 0xebb   :  { %v1045_v10 = vmax.f32 %v1042_v8, 0.0  ;;  %v1958_v8 = vpack.c.bf16 %v1509_v7, %v1508_v6 }
 0xebd   :  { %v1046_v11 = vmul.f32 %v1045_v10, %v2419_v35 }
 0xebf   :  { %1858 = vmatmul.mubr.msk.f32.vlgmr.msra.gmra.mrb[12].mxu0 %vm228_vm2, %v1046_v11 }
 0xec0   :  { %1873 = vmatprep.mubr.msk.f32.mxu0 %vm2170_vm0, %v2171_v2 }
 0xf92   :  { %v1129_v13 = vpop.f32.mrb[12].mxu0 }
 0xf93   :  { %v1130_v14 = vadd.f32 %v1683_v12, %v1129_v13  ;;  %v1859_v15 = vpop.f32.mrb[13].mxu0 }
 0xf95   :  { %v1133_v16 = vmax.f32 %v1130_v14, 0.0 }
 0xf97   :  { %v1134_v17 = vadd.f32 %v1133_v16, %v2419_v35 }
 0xf99   :  { %v1139_v18 = vsel %vm228_vm2, %v1134_v17, 0.0 }
 0xf9a   :  { %1140 = vadd.xlane.f32.xlu0 %v1139_v18 }
0x1027   :  { %v1141_v19 = vpop.xlane.xlu0 %1140 }
0x1028   :  { %v1142_v20 = vmul.f32 0.03125, %v1141_v19 }
0x102a   :  { %v1143_v21 = vsub.f32 %v1134_v17, %v1142_v20 }
0x102c   :  { %v1144_v22 = vmul.f32 %v1143_v21, %v1143_v21 }
0x102e   :  { %v1145_v23 = vsel %vm228_vm2, %v1144_v22, 0.0 }
0x102f   :  { %1146 = vadd.xlane.f32.xlu1 %v1145_v23 }
0x10bc   :  { %v1147_v30 = vpop.xlane.xlu1 %1146 }
0x10bd   :  { %v1148_v31 = vmul.f32 0.03125, %v1147_v30 }
0x10bf   :  { %v1149_v32 = vadd.f32 1e-05, %v1148_v31  ;;  %v1704_v31 = vld [vmem:[%s2530_s12 + $0x2] ss:$0 sm:$0xff] }
0x10c1   :  { %1986 = vrsqrt.f32 %v1149_v32 }
0x10cb   :  { %v1987_v33 = vpop.eup %1986 }
0x10cc   :  { %v1151_v35 = vmul.f32 %v1987_v33, %v1143_v21  ;;  %v1705_v33 = vld [vmem:[%s2531_s13] ss:$0 sm:$0xff] }
0x10ce   :  { %v1158_v37 = vmul.f32 %v1687_v34, %v1151_v35 }
0x10d0   :  { %v2469_v38 = vadd.f32 %v1688_v36, %v1158_v37  ;;  %v1706_v37 = vld [vmem:[#allocation2] ss:$0 sm:$0xff] }
0x10d2   :  { %1869 = vmatmul.mubr.msk.f32.vlgmr.msra.gmra.mrb[8].mxu1 %vm228_vm2, %v2469_v38 }
0x10d3   :  { %1889 = vmatprep.mubr.msk.f32.mxu1 %vm2170_vm0, %v2171_v2  ;;  %1950 = vmatpush3.bf16.msra.mxu1 %v1949_v56 }
0x10d4   :  { %1951 = vmatprep.subr.bf16.mxu1 %v2169_v1 }
0x10d7   :  { %1953 = vmatpush3.bf16.msra.mxu1 %v1952_v58 }
0x11a5   :  { %v1248_v40 = vpop.f32.mrb[8].mxu1 }
0x11a6   :  { %v1249_v41 = vadd.f32 %v1690_v39, %v1248_v40  ;;  %v1870_v42 = vpop.f32.mrb[9].mxu1 }
0x11a8   :  { %1253 = vrot.lane.b32.xlu1 %v1249_v41, %s2172_s27 }
0x121a   :  { %v1254_v43 = vpop.permute.xlu1 %1253 }
0x121b   :  { %1872 = vmatpush3.xpose.msk.msra.mxu0 %vm228_vm2, %v1254_v43 }
0x121c   :  { %1876 = vmatprep.subr.mxu0 %v2171_v2 }
0x121e   :  { %1874 = vmatmul.mubr.msk.f32.vlgmr.msra.gmra.mrb[14].mxu0 %vm228_vm2, %v1249_v41 }
0x121f   :  { %1878 = vmatprep.mubr.msk.f32.mxu0 %vm2170_vm0, %v2171_v2 }
0x12f1   :  { %v1325_v44 = vpop.f32.mrb[14].mxu0 }
0x12f2   :  { %v1329_v45 = vmul.f32 0.17677669, %v1325_v44  ;;  %v1875_v46 = vpop.f32.mrb[15].mxu0 }
0x12f4   :  { %v1330_v47 = vsel %vm419_vm3, %v1329_v45, -inf }
0x12f5   :  { %1331 = vmax.xlane.f32.xlu1 %v1330_v47 }
0x1382   :  { %v1332_v48 = vpop.xlane.xlu1 %1331 }
0x1383   :  { %v1333_v49 = vsub.f32 %v1329_v45, %v1332_v48 }
0x1385   :  { %v1334_v50 = vmul.f32 1.442695, %v1333_v49 }
0x1387   :  { %1988 = vpow2.f32 %v1334_v50 }
0x1391   :  { %v1989_v51 = vpop.eup %1988 }
0x1392   :  { %v1336_v52 = vsel %vm419_vm3, %v1989_v51, 0.0 }
0x1393   :  { %1337 = vadd.xlane.f32.xlu0 %v1336_v52 }
0x13a9   :  { %1341 = vrot.lane.b32.xlu0 %v1249_v41, %s2173_s4 }
0x1420   :  { %v1338_v59 = vpop.xlane.xlu0 %1337 }
0x1421   :  { %1990 = vrcp.f32 %v1338_v59 }
0x1424   :  { %v1342_v60 = vpop.permute.xlu0 %1341 }
0x1425   :  { %1877 = vmatpush3.msra.mxu0 %v1342_v60 }
0x1426   :  { %1954 = vmatprep.subr.bf16.mxu0 %v2169_v1 }
0x142b   :  { %v1991_v61 = vpop.eup %1990 }
0x142c   :  { %v1340_v62 = vmul.f32 %v1991_v61, %v1989_v51 }
0x142e   :  { %1879 = vmatmul.mubr.msk.f32.vlgmr.msra.gmra.mrb[16].mxu0 %vm419_vm3, %v1340_v62 }
0x142f   :  { %1900 = vmatprep.mubr.msk.f32.mxu0 %vm2170_vm0, %v2171_v2  ;;  %1956 = vmatpush3.bf16.msra.mxu0 %v1955_v5 }
0x1430   :  { %1957 = vmatprep.subr.bf16.mxu0 %v2169_v1  ;;  %v1699_v1 = vld [vmem:[%s2528_s10 + $0x2] ss:$0 sm:$0xff] }
0x1433   :  { %1959 = vmatpush3.bf16.msra.mxu0 %v1958_v8 }
0x1501   :  { %v1413_v63 = vpop.f32.mrb[16].mxu0 }
0x1502   :  { %v1880_v0 = vpop.f32.mrb[17].mxu0  ;;  %1890 = vmatmul.mubr.msk.f32.vlgmr.msra.gmra.mrb[10].mxu1 %vm228_vm2, %v1413_v63 }
0x15d5   :  { %v1499_v10 = vpop.f32.mrb[10].mxu1 }
0x15d6   :  { %v1500_v2 = vadd.f32 %v1696_v9, %v1499_v10  ;;  %v1891_v11 = vpop.f32.mrb[11].mxu1 }
0x15d8   :  { %v1503_v12 = vmax.f32 %v1500_v2, 0.0 }
0x15da   :  { %v1504_v13 = vmul.f32 %v1503_v12, %v2469_v38 }
0x15dc   :  { %1901 = vmatmul.mubr.msk.f32.vlgmr.msra.gmra.mrb[18].mxu0 %vm228_vm2, %v1504_v13 }
0x16af   :  { %v1587_v14 = vpop.f32.mrb[18].mxu0 }
0x16b0   :  { %v1588_v15 = vadd.f32 %v1699_v1, %v1587_v14  ;;  %v1902_v16 = vpop.f32.mrb[19].mxu0 }
0x16b2   :  { %v1591_v17 = vmax.f32 %v1588_v15, 0.0 }
0x16b4   :  { %v1592_v18 = vadd.f32 %v1591_v17, %v2469_v38 }
0x16b6   :  { %v1597_v19 = vsel %vm228_vm2, %v1592_v18, 0.0 }
0x16b7   :  { %1598 = vadd.xlane.f32.xlu0 %v1597_v19 }
0x1744   :  { %v1599_v20 = vpop.xlane.xlu0 %1598 }
0x1745   :  { %v1600_v21 = vmul.f32 0.03125, %v1599_v20 }
0x1747   :  { %v1601_v22 = vsub.f32 %v1592_v18, %v1600_v21 }
0x1749   :  { %v1602_v23 = vmul.f32 %v1601_v22, %v1601_v22 }
0x174b   :  { %v1603_v24 = vsel %vm228_vm2, %v1602_v23, 0.0 }
0x174c   :  { %1604 = vadd.xlane.f32.xlu1 %v1603_v24 }
0x17d9   :  { %v1605_v25 = vpop.xlane.xlu1 %1604 }
0x17da   :  { %v1606_v26 = vmul.f32 0.03125, %v1605_v25 }
0x17dc   :  { %v1607_v27 = vadd.f32 1e-05, %v1606_v26 }
0x17de   :  { %1992 = vrsqrt.f32 %v1607_v27 }
0x17e8   :  { %v1993_v28 = vpop.eup %1992 }
0x17e9   :  { %v1609_v30 = vmul.f32 %v1993_v28, %v1601_v22 }
0x17eb   :  { %v1616_v32 = vmul.f32 %v1703_v29, %v1609_v30 }
0x17ed   :  { %v1623_v34 = vadd.f32 %v1704_v31, %v1616_v32 }
0x17ef   :  { %v1631_v35 = vmul.f32 %v1705_v33, %v1623_v34 }
0x17f1   :  { %v1632_v36 = vsel %vm228_vm2, %v1631_v35, 0.0 }
0x17f2   :  { %1633 = vadd.xlane.f32.xlu1 %v1632_v36 }
0x187f   :  { %v1634_v38 = vpop.xlane.xlu1 %1633 }
0x1880   :  { %v1642_v39 = vadd.f32 %v1706_v37, %v1634_v38 }
0x1882   :  { %v1643_v40 = vsub.f32 0.0, %v1642_v39 }
0x1884   :  { %v1644_v41 = vmul.f32 1.442695, %v1643_v40 }
0x1886   :  { %1994 = vpow2.f32 %v1644_v41 }
0x1890   :  { %v1995_v42 = vpop.eup %1994 }
0x1891   :  { %v1646_v43 = vadd.f32 1.0, %v1995_v42 }
0x1893   :  { %1996 = vrcp.f32 %v1646_v43 }
0x189d   :  { %v1997_v44 = vpop.eup %1996 }
0x189e   :  { %1649 = vst.msk [vmem:[%s2533_s15] sm:$0xff] %vm1648_vm4, %v1997_v44 }
0x189f   :  { %1654 = vsyncpa [#allocation4], 1 }
0x18a0   :  { %1655 = vsyncpa [#allocation6], 1 }
0x18a1   :  { %1656 = vsyncpa [#allocation9], 1 }
0x18a2   :  { %1657 = vsyncpa [#allocation12], 1 }

</bundles_post_ra>
